<compile_context>
chip_gen: v6e
topology: v6e:2x2x1
jax: 0.10.0
libtpu: 0.0.40
codegen_flags: <defaults>
</compile_context>

<pallas_src>
import math
import functools

import jax
import jax.numpy as jnp
from jax.experimental import pallas as pl
from jax.experimental.pallas import tpu as pltpu

LN_EPS = 1e-5
LANE = 128


def _round_up(n, m):
    return ((n + m - 1) // m) * m


def _gelu_tanh(x):
    # tanh-approximate GELU (EUP-friendly).
    # TODO(synk): PyTorch nn.GELU() default is the exact erf form; the tanh
    # approximation differs by ~1e-3 relative but moves the transcendental off
    # the saturated VALU slot onto the EUP -- deliberate numerics change.
    c = 0.7978845608028654  # sqrt(2/pi)
    return 0.5 * x * (1.0 + jnp.tanh(c * (x + 0.044715 * x * x * x)))


def mlp_kernel(x_ref, g_ref, bt_ref,
               w1_ref, b1_ref, w2_ref, b2_ref, w3_ref, b3_ref,
               o_ref, *, compute_dtype):
    x = x_ref[...].astype(jnp.float32)

    # LayerNorm over the real (un-padded) feature axis.
    mu = jnp.mean(x, axis=-1, keepdims=True)
    xc = x - mu
    var = jnp.mean(xc * xc, axis=-1, keepdims=True)
    h = xc * jax.lax.rsqrt(var + LN_EPS)
    h = h * g_ref[...] + bt_ref[...]

    # Linear(in, 4*out) + GELU   (bf16 operands cast right before the dot,
    # f32 MXU accumulation; elementwise stays f32 -- v5e-friendly).
    h = jnp.dot(h.astype(compute_dtype), w1_ref[...],
                preferred_element_type=jnp.float32) + b1_ref[...]
    h = _gelu_tanh(h)

    # Linear(4*out, 4*out) + GELU
    h = jnp.dot(h.astype(compute_dtype), w2_ref[...],
                preferred_element_type=jnp.float32) + b2_ref[...]
    h = _gelu_tanh(h)

    # Linear(4*out, out)
    h = jnp.dot(h.astype(compute_dtype), w3_ref[...],
                preferred_element_type=jnp.float32) + b3_ref[...]

    o_ref[...] = h.astype(o_ref.dtype)


def prepare_params(params, *, use_bf16=True):
    """Pad hidden/output feature dims to lane multiples and cast weights ONCE.

    Hoisted out of the forward wrapper so the pad/cast XLA passes over the
    weights do not re-run on every call.
    """
    gamma, beta, w1, b1, w2, b2, w3, b3 = params
    D, hid = w1.shape
    out_size = w3.shape[1]
    H_p = _round_up(hid, LANE)
    O_p = _round_up(out_size, LANE)
    wdt = jnp.bfloat16 if use_bf16 else jnp.float32

    def pad2(a, r, c, dt):
        return jnp.pad(a, ((0, r - a.shape[0]), (0, c - a.shape[1]))).astype(dt)

    arrays = (
        gamma.reshape(1, D).astype(jnp.float32),
        beta.reshape(1, D).astype(jnp.float32),
        pad2(w1, D, H_p, wdt),
        jnp.pad(b1, (0, H_p - hid)).reshape(1, H_p).astype(jnp.float32),
        pad2(w2, H_p, H_p, wdt),
        jnp.pad(b2, (0, H_p - hid)).reshape(1, H_p).astype(jnp.float32),
        pad2(w3, H_p, O_p, wdt),
        jnp.pad(b3, (0, O_p - out_size)).reshape(1, O_p).astype(jnp.float32),
    )
    return {"arrays": arrays, "D": D, "hid": hid, "out_size": out_size,
            "H_p": H_p, "O_p": O_p, "compute_dtype": wdt}


def continuous_embedding_mlp(x, prepped, *, row_tile=512):
    """x: (B, S, input_size) float32.  Returns (B, S, output_size)."""
    arrays = prepped["arrays"]
    D = prepped["D"]
    hid = prepped["hid"]
    out_size = prepped["out_size"]
    H_p = prepped["H_p"]
    O_p = prepped["O_p"]
    wdt = prepped["compute_dtype"]

    B, S, Dx = x.shape
    assert Dx == D
    N = B * S

    # Adaptive row tile: amortize per-grid-step overhead but keep >= 2 grid
    # steps so both of v7x's TensorCores get work (harmless on v5e/v6e).
    rt = min(row_tile, _round_up(max(pl.cdiv(N, 2), 8), 8))
    rt = max(8, rt)
    grid_n = pl.cdiv(N, rt)
    N_p = grid_n * rt

    xf = x.reshape(N, D)
    if N_p != N:
        # Only pad rows when the grid doesn't divide evenly.
        xf = jnp.pad(xf, ((0, N_p - N), (0, 0)))

    wbytes = jnp.dtype(wdt).itemsize
    cost = pl.CostEstimate(
        flops=2 * N * (D * hid + hid * hid + hid * out_size),
        transcendentals=2 * N * hid,
        bytes_accessed=(N * D + N * out_size) * 4
        + (D * H_p + H_p * H_p + H_p * O_p) * wbytes,
    )

    const = lambda shp: pl.BlockSpec(shp, lambda i: (0, 0))

    out = pl.pallas_call(
        functools.partial(mlp_kernel, compute_dtype=wdt),
        out_shape=jax.ShapeDtypeStruct((N_p, O_p), x.dtype),
        grid_spec=pltpu.PrefetchScalarGridSpec(
            num_scalar_prefetch=0,
            grid=(grid_n,),
            in_specs=[
                pl.BlockSpec((rt, D), lambda i: (i, 0)),   # x rows (no lane pad)
                const((1, D)), const((1, D)),              # LN gamma, beta
                const((D, H_p)), const((1, H_p)),          # w1, b1
                const((H_p, H_p)), const((1, H_p)),        # w2, b2
                const((H_p, O_p)), const((1, O_p)),        # w3, b3
            ],
            out_specs=pl.BlockSpec((rt, O_p), lambda i: (i, 0)),
        ),
        compiler_params=pltpu.CompilerParams(
            dimension_semantics=("parallel",),
            # 32 MiB is plenty for 128-padded sizes; re-derive for v7x (64 MiB
            # physical) if D / hid / row_tile grow.
            vmem_limit_bytes=32 * 1024 * 1024,
        ),
        cost_estimate=cost,
    )(xf, *arrays)

    if N_p != N or O_p != out_size:
        out = out[:N, :out_size]
    return out.reshape(B, S, out_size)


def init_params(key, input_size, output_size, *, bias=0.0, scale=1.0):
    """Deterministic synthetic params (shapes match the PyTorch module)."""
    mlp_factor = 4
    hid = mlp_factor * output_size
    k1, k2, k3 = jax.random.split(key, 3)

    def linear(k, fan_in, fan_out):
        bound = 1.0 / math.sqrt(fan_in)
        kw, kb = jax.random.split(k)
        w = jax.random.uniform(kw, (fan_in, fan_out), jnp.float32, -bound, bound)
        b = jax.random.uniform(kb, (fan_out,), jnp.float32, -bound, bound)
        return w, b

    gamma = jnp.full((input_size,), scale, jnp.float32)   # norm.weight.fill_(scale)
    beta = jnp.full((input_size,), bias, jnp.float32)     # norm.bias.fill_(bias)
    w1, b1 = linear(k1, input_size, hid)
    w2, b2 = linear(k2, hid, hid)
    w3, b3 = linear(k3, hid, output_size)
    return (gamma, beta, w1, b1, w2, b2, w3, b3)


def reference_forward(x, params, *, approximate=False):
    gamma, beta, w1, b1, w2, b2, w3, b3 = params
    mu = jnp.mean(x, axis=-1, keepdims=True)
    var = jnp.mean((x - mu) ** 2, axis=-1, keepdims=True)
    h = (x - mu) / jnp.sqrt(var + LN_EPS) * gamma + beta
    h = jax.nn.gelu(h @ w1 + b1, approximate=approximate)
    h = jax.nn.gelu(h @ w2 + b2, approximate=approximate)
    return h @ w3 + b3


if __name__ == "__main__":
    batch, seq = 4, 128            # N = 512 tokens -> 2 grid steps at rt=256
    input_size, output_size = 32, 16

    key = jax.random.PRNGKey(0)
    kx, kp = jax.random.split(key)
    x = jax.random.normal(kx, (batch, seq, input_size), jnp.float32)
    params = init_params(kp, input_size, output_size)

    # Pad/cast the weights once (hoisted out of the forward path).
    prepped_bf16 = prepare_params(params, use_bf16=True)
    prepped_f32 = prepare_params(params, use_bf16=False)

    out = jax.block_until_ready(continuous_embedding_mlp(x, prepped_bf16))
    assert out.shape == (batch, seq, output_size)

    ref_exact = reference_forward(x, params, approximate=False)  # PyTorch nn.GELU()
    ref_tanh = reference_forward(x, params, approximate=True)    # kernel's GELU form

    # f32 path: tight check against the tanh-GELU reference (kernel mechanics),
    # loose check against the exact-erf reference (flagged numerics change).
    out_f32 = jax.block_until_ready(continuous_embedding_mlp(x, prepped_f32))
    assert jnp.allclose(out_f32, ref_tanh, atol=1e-4, rtol=1e-4), "f32 mismatch vs tanh reference"
    assert jnp.allclose(out_f32, ref_exact, atol=5e-2, rtol=5e-2), "f32 mismatch vs exact-GELU reference"

    # bf16 MXU operands (f32 accumulation) -> relaxed tolerance.
    assert jnp.allclose(out, ref_tanh, atol=3e-2, rtol=3e-2), "bf16 mismatch vs tanh reference"

    print("KERNEL_OK")
</pallas_src>

<mosaic_0001>
module attributes {stable_mosaic.version = 11 : i64} {
  func.func @mlp_kernel(%arg0: i32, %arg1: memref<256x32xf32, #tpu.memory_space<vmem>>, %arg2: memref<1x32xf32, #tpu.memory_space<vmem>>, %arg3: memref<1x32xf32, #tpu.memory_space<vmem>>, %arg4: memref<32x128xbf16, #tpu.memory_space<vmem>>, %arg5: memref<1x128xf32, #tpu.memory_space<vmem>>, %arg6: memref<128x128xbf16, #tpu.memory_space<vmem>>, %arg7: memref<1x128xf32, #tpu.memory_space<vmem>>, %arg8: memref<128x128xbf16, #tpu.memory_space<vmem>>, %arg9: memref<1x128xf32, #tpu.memory_space<vmem>>, %arg10: memref<256x128xf32, #tpu.memory_space<vmem>>) attributes {dimension_semantics = [#tpu.dimension_semantics<parallel>], iteration_bounds = array<i64: 2>, scalar_prefetch = 0 : i64, scratch_operands = 0 : i64, tpu.core_type = #tpu.core_type<tc>, window_params = [{transform_indices = @transform_0, window_bounds = array<i64: 256, 32>}, {pipeline_mode = #tpu.pipeline_mode<synchronous>, transform_indices = @transform_1, window_bounds = array<i64: 1, 32>}, {pipeline_mode = #tpu.pipeline_mode<synchronous>, transform_indices = @transform_2, window_bounds = array<i64: 1, 32>}, {pipeline_mode = #tpu.pipeline_mode<synchronous>, transform_indices = @transform_3, window_bounds = array<i64: 32, 128>}, {pipeline_mode = #tpu.pipeline_mode<synchronous>, transform_indices = @transform_4, window_bounds = array<i64: 1, 128>}, {pipeline_mode = #tpu.pipeline_mode<synchronous>, transform_indices = @transform_5, window_bounds = array<i64: 128, 128>}, {pipeline_mode = #tpu.pipeline_mode<synchronous>, transform_indices = @transform_6, window_bounds = array<i64: 1, 128>}, {pipeline_mode = #tpu.pipeline_mode<synchronous>, transform_indices = @transform_7, window_bounds = array<i64: 128, 128>}, {pipeline_mode = #tpu.pipeline_mode<synchronous>, transform_indices = @transform_8, window_bounds = array<i64: 1, 128>}, {transform_indices = @transform_9, window_bounds = array<i64: 256, 128>}]} {
    %c0 = arith.constant 0 : index
    %c0_0 = arith.constant 0 : index
    %0 = vector.load %arg1[%c0, %c0_0] : memref<256x32xf32, #tpu.memory_space<vmem>>, vector<256x32xf32>
    %cst = arith.constant dense<0.000000e+00> : vector<256xf32>
    %1 = vector.multi_reduction <add>, %0, %cst [1] : vector<256x32xf32> to vector<256xf32>
    %2 = vector.shape_cast %1 : vector<256xf32> to vector<256x1xf32>
    %cst_1 = arith.constant 3.200000e+01 : f32
    %3 = vector.broadcast %cst_1 : f32 to vector<256x1xf32>
    %4 = arith.divf %2, %3 : vector<256x1xf32>
    %5 = vector.broadcast %4 : vector<256x1xf32> to vector<256x32xf32>
    %6 = arith.subf %0, %5 : vector<256x32xf32>
    %7 = arith.mulf %6, %6 : vector<256x32xf32>
    %cst_2 = arith.constant dense<0.000000e+00> : vector<256xf32>
    %8 = vector.multi_reduction <add>, %7, %cst_2 [1] : vector<256x32xf32> to vector<256xf32>
    %9 = vector.shape_cast %8 : vector<256xf32> to vector<256x1xf32>
    %cst_3 = arith.constant 3.200000e+01 : f32
    %10 = vector.broadcast %cst_3 : f32 to vector<256x1xf32>
    %11 = arith.divf %9, %10 : vector<256x1xf32>
    %cst_4 = arith.constant 9.99999974E-6 : f32
    %12 = vector.broadcast %cst_4 : f32 to vector<256x1xf32>
    %13 = arith.addf %11, %12 : vector<256x1xf32>
    %14 = math.rsqrt %13 : vector<256x1xf32>
    %15 = vector.broadcast %14 : vector<256x1xf32> to vector<256x32xf32>
    %16 = arith.mulf %6, %15 : vector<256x32xf32>
    %c0_5 = arith.constant 0 : index
    %c0_6 = arith.constant 0 : index
    %17 = vector.load %arg2[%c0_5, %c0_6] : memref<1x32xf32, #tpu.memory_space<vmem>>, vector<1x32xf32>
    %18 = vector.broadcast %17 : vector<1x32xf32> to vector<256x32xf32>
    %19 = arith.mulf %16, %18 : vector<256x32xf32>
    %c0_7 = arith.constant 0 : index
    %c0_8 = arith.constant 0 : index
    %20 = vector.load %arg3[%c0_7, %c0_8] : memref<1x32xf32, #tpu.memory_space<vmem>>, vector<1x32xf32>
    %21 = vector.broadcast %20 : vector<1x32xf32> to vector<256x32xf32>
    %22 = arith.addf %19, %21 : vector<256x32xf32>
    %23 = arith.truncf %22 : vector<256x32xf32> to vector<256x32xbf16>
    %c0_9 = arith.constant 0 : index
    %c0_10 = arith.constant 0 : index
    %24 = vector.load %arg4[%c0_9, %c0_10] : memref<32x128xbf16, #tpu.memory_space<vmem>>, vector<32x128xbf16>
    %cst_11 = arith.constant dense<0.000000e+00> : vector<256x128xf32>
    %25 = tpu.matmul %23, %24, %cst_11 {dimension_numbers = #tpu.dot_dimension_numbers<[1], [0], [0], [1], [0, 0, 1, 1], [], []>} : vector<256x32xbf16>, vector<32x128xbf16>, vector<256x128xf32> -> vector<256x128xf32>
    %c0_12 = arith.constant 0 : index
    %c0_13 = arith.constant 0 : index
    %26 = vector.load %arg5[%c0_12, %c0_13] : memref<1x128xf32, #tpu.memory_space<vmem>>, vector<1x128xf32>
    %27 = vector.broadcast %26 : vector<1x128xf32> to vector<256x128xf32>
    %28 = arith.addf %25, %27 : vector<256x128xf32>
    %cst_14 = arith.constant 5.000000e-01 : f32
    %29 = vector.broadcast %cst_14 : f32 to vector<256x128xf32>
    %30 = arith.mulf %29, %28 : vector<256x128xf32>
    %cst_15 = arith.constant 4.471500e-02 : f32
    %31 = vector.broadcast %cst_15 : f32 to vector<256x128xf32>
    %32 = arith.mulf %31, %28 : vector<256x128xf32>
    %33 = arith.mulf %32, %28 : vector<256x128xf32>
    %34 = arith.mulf %33, %28 : vector<256x128xf32>
    %35 = arith.addf %28, %34 : vector<256x128xf32>
    %cst_16 = arith.constant 0.797884583 : f32
    %36 = vector.broadcast %cst_16 : f32 to vector<256x128xf32>
    %37 = arith.mulf %36, %35 : vector<256x128xf32>
    %38 = math.tanh %37 : vector<256x128xf32>
    %cst_17 = arith.constant 1.000000e+00 : f32
    %39 = vector.broadcast %cst_17 : f32 to vector<256x128xf32>
    %40 = arith.addf %39, %38 : vector<256x128xf32>
    %41 = arith.mulf %30, %40 : vector<256x128xf32>
    %42 = arith.truncf %41 : vector<256x128xf32> to vector<256x128xbf16>
    %c0_18 = arith.constant 0 : index
    %c0_19 = arith.constant 0 : index
    %43 = vector.load %arg6[%c0_18, %c0_19] : memref<128x128xbf16, #tpu.memory_space<vmem>>, vector<128x128xbf16>
    %cst_20 = arith.constant dense<0.000000e+00> : vector<256x128xf32>
    %44 = tpu.matmul %42, %43, %cst_20 {dimension_numbers = #tpu.dot_dimension_numbers<[1], [0], [0], [1], [0, 0, 1, 1], [], []>} : vector<256x128xbf16>, vector<128x128xbf16>, vector<256x128xf32> -> vector<256x128xf32>
    %c0_21 = arith.constant 0 : index
    %c0_22 = arith.constant 0 : index
    %45 = vector.load %arg7[%c0_21, %c0_22] : memref<1x128xf32, #tpu.memory_space<vmem>>, vector<1x128xf32>
    %46 = vector.broadcast %45 : vector<1x128xf32> to vector<256x128xf32>
    %47 = arith.addf %44, %46 : vector<256x128xf32>
    %cst_23 = arith.constant 5.000000e-01 : f32
    %48 = vector.broadcast %cst_23 : f32 to vector<256x128xf32>
    %49 = arith.mulf %48, %47 : vector<256x128xf32>
    %cst_24 = arith.constant 4.471500e-02 : f32
    %50 = vector.broadcast %cst_24 : f32 to vector<256x128xf32>
    %51 = arith.mulf %50, %47 : vector<256x128xf32>
    %52 = arith.mulf %51, %47 : vector<256x128xf32>
    %53 = arith.mulf %52, %47 : vector<256x128xf32>
    %54 = arith.addf %47, %53 : vector<256x128xf32>
    %cst_25 = arith.constant 0.797884583 : f32
    %55 = vector.broadcast %cst_25 : f32 to vector<256x128xf32>
    %56 = arith.mulf %55, %54 : vector<256x128xf32>
    %57 = math.tanh %56 : vector<256x128xf32>
    %cst_26 = arith.constant 1.000000e+00 : f32
    %58 = vector.broadcast %cst_26 : f32 to vector<256x128xf32>
    %59 = arith.addf %58, %57 : vector<256x128xf32>
    %60 = arith.mulf %49, %59 : vector<256x128xf32>
    %61 = arith.truncf %60 : vector<256x128xf32> to vector<256x128xbf16>
    %c0_27 = arith.constant 0 : index
    %c0_28 = arith.constant 0 : index
    %62 = vector.load %arg8[%c0_27, %c0_28] : memref<128x128xbf16, #tpu.memory_space<vmem>>, vector<128x128xbf16>
    %cst_29 = arith.constant dense<0.000000e+00> : vector<256x128xf32>
    %63 = tpu.matmul %61, %62, %cst_29 {dimension_numbers = #tpu.dot_dimension_numbers<[1], [0], [0], [1], [0, 0, 1, 1], [], []>} : vector<256x128xbf16>, vector<128x128xbf16>, vector<256x128xf32> -> vector<256x128xf32>
    %c0_30 = arith.constant 0 : index
    %c0_31 = arith.constant 0 : index
    %64 = vector.load %arg9[%c0_30, %c0_31] : memref<1x128xf32, #tpu.memory_space<vmem>>, vector<1x128xf32>
    %65 = vector.broadcast %64 : vector<1x128xf32> to vector<256x128xf32>
    %66 = arith.addf %63, %65 : vector<256x128xf32>
    %c0_32 = arith.constant 0 : index
    %c0_33 = arith.constant 0 : index
    %67 = vector.load %arg10[%c0_32, %c0_33] : memref<256x128xf32, #tpu.memory_space<vmem>>, vector<256x128xf32>
    tpu.vector_store %arg10[%c0_32, %c0_33], %66 {strides = array<i32>} : memref<256x128xf32, #tpu.memory_space<vmem>>, vector<256x128xf32>,
    return
  }
  func.func @transform_0(%arg0: i32) -> (i32, i32) {
    %c0_i32 = arith.constant 0 : i32
    %c0_i32_0 = arith.constant 0 : i32
    return %arg0, %c0_i32 : i32, i32
  }
  func.func @transform_1(%arg0: i32) -> (i32, i32) {
    %c0_i32 = arith.constant 0 : i32
    %c0_i32_0 = arith.constant 0 : i32
    %c0_i32_1 = arith.constant 0 : i32
    return %c0_i32, %c0_i32_0 : i32, i32
  }
  func.func @transform_2(%arg0: i32) -> (i32, i32) {
    %c0_i32 = arith.constant 0 : i32
    %c0_i32_0 = arith.constant 0 : i32
    %c0_i32_1 = arith.constant 0 : i32
    return %c0_i32, %c0_i32_0 : i32, i32
  }
  func.func @transform_3(%arg0: i32) -> (i32, i32) {
    %c0_i32 = arith.constant 0 : i32
    %c0_i32_0 = arith.constant 0 : i32
    %c0_i32_1 = arith.constant 0 : i32
    return %c0_i32, %c0_i32_0 : i32, i32
  }
  func.func @transform_4(%arg0: i32) -> (i32, i32) {
    %c0_i32 = arith.constant 0 : i32
    %c0_i32_0 = arith.constant 0 : i32
    %c0_i32_1 = arith.constant 0 : i32
    return %c0_i32, %c0_i32_0 : i32, i32
  }
  func.func @transform_5(%arg0: i32) -> (i32, i32) {
    %c0_i32 = arith.constant 0 : i32
    %c0_i32_0 = arith.constant 0 : i32
    %c0_i32_1 = arith.constant 0 : i32
    return %c0_i32, %c0_i32_0 : i32, i32
  }
  func.func @transform_6(%arg0: i32) -> (i32, i32) {
    %c0_i32 = arith.constant 0 : i32
    %c0_i32_0 = arith.constant 0 : i32
    %c0_i32_1 = arith.constant 0 : i32
    return %c0_i32, %c0_i32_0 : i32, i32
  }
  func.func @transform_7(%arg0: i32) -> (i32, i32) {
    %c0_i32 = arith.constant 0 : i32
    %c0_i32_0 = arith.constant 0 : i32
    %c0_i32_1 = arith.constant 0 : i32
    return %c0_i32, %c0_i32_0 : i32, i32
  }
  func.func @transform_8(%arg0: i32) -> (i32, i32) {
    %c0_i32 = arith.constant 0 : i32
    %c0_i32_0 = arith.constant 0 : i32
    %c0_i32_1 = arith.constant 0 : i32
    return %c0_i32, %c0_i32_0 : i32, i32
  }
  func.func @transform_9(%arg0: i32) -> (i32, i32) {
    %c0_i32 = arith.constant 0 : i32
    %c0_i32_0 = arith.constant 0 : i32
    return %arg0, %c0_i32 : i32, i32
  }
}

</mosaic_0001>

<bundles_post_ra>
// kernel: tpu_custom_call.1
= control target key start
LH: loop header
LB: loop body
LE: loop exit
PB: predicated region body
PF: predicated region fallthrough
CT: control target
= control target key end

     0   :  { %14 = vsyncpa [#allocation3], 0  ;;  %s4197_s0 = inlined_call_operand.vmem [shape: f32[512,32], index: 0, kind: input, shape index: {}]   ;;  %s4198_s1 = inlined_call_operand.vmem [shape: f32[1,32], index: 1, kind: input, shape index: {}]   ;;  %s4199_s2 = inlined_call_operand.vmem [shape: f32[1,32], index: 2, kind: input, shape index: {}]   ;;  %s4200_s3 = inlined_call_operand.vmem [shape: bf16[32,128], index: 3, kind: input, shape index: {}]   ;;  %s4201_s4 = inlined_call_operand.vmem [shape: f32[1,128], index: 4, kind: input, shape index: {}]   ;;  %s4202_s5 = inlined_call_operand.vmem [shape: bf16[128,128], index: 5, kind: input, shape index: {}]   ;;  %s4203_s6 = inlined_call_operand.vmem [shape: f32[1,128], index: 6, kind: input, shape index: {}]   ;;  %s4204_s7 = inlined_call_operand.vmem [shape: bf16[128,128], index: 7, kind: input, shape index: {}]   ;;  %s4205_s8 = inlined_call_operand.vmem [shape: f32[1,128], index: 8, kind: input, shape index: {}]   ;;  %s4206_s9 = inlined_call_operand.hbm [shape: f32[512,128], index: 9, kind: output, shape index: {}]  }
   0x1   :  { %16 = vsyncpa [#allocation3 + $0x1], 0  ;;  %s2911_s30 = smov 0   ;;  %s2913_s10 = smov 0  }
   0x2   :  { %s2915_s11 = smov 0   ;;  %s2917_s12 = smov 0  }
   0x3 LB: > { %s2932_s13 = sadd.s32 4294967295, %s2856_s12   ;;  %s2291_s14 = sadd.s32 4294967294, %s2856_s12   ;;  %s2856_s12 = sphi %s2917_s12, %s4212_s12   ;;  %s2852_s11 = sphi %s2915_s11, %s4211_s11   ;;  %s2848_s10 = sphi %s2913_s10, %s4210_s10   ;;  %s2844_s30 = sphi %s2911_s30, %s4209_s30  }
   0x4   : > { %s2936_s15 = sadd.s32 1, %s2856_s12   ;;  %s223_s16 = sadd.s32 1, %s2852_s11 }
   0x5   : > { %s220_s17 = ssub.s32 %s2856_s12, %s2936_s15  ;;  %p233_p0 = scmp.ne.s32.totalorder %s2852_s11, %s2848_s10 }
   0x6   : > { %p221_p1 = scmp.eq.s32.totalorder %s220_s17, 0  ;;  %p234_p2 = scmp.eq.s32.totalorder %s2932_s13, 1 }
   0x7   : > { %p239_p3 = scmp.ne.s32.totalorder %s2848_s10, %s2844_s30  ;;  %p240_p4 = scmp.eq.s32.totalorder %s2291_s14, 1 }
   0x8   : > { %s2947_s18 = scalar_select %p221_p1, %s2852_s11, %s223_s16  }
   0x9   : > { %p2949_p5 = por %p234_p2, %p233_p0  ;;  %p2953_p6 = por %p240_p4, %p239_p3 }
   0xa   : > { %p2294_p7 = scmp.ge.s32.totalorder %s2856_s12, 1  ;;  %p291_p8 = scmp.lt.s32.totalorder %s2856_s12, 3 }
   0xc   : > { %p292_p9 = pnand %p2294_p7, %p291_p8 }
   0xd   : > { %s2296_s21 = sshll.u32 (!%p292_p9), %s2932_s13, 5  ;;  %s2342_s27 = sshll.u32 (!%p292_p9), %s2932_s13, 12 }
   0xe   : > { %295 = sbr.rel (%p292_p9) target bundleno = 1095 (0x447), region = 56  ;;  %p328_p10 = scmp.lt.s32.totalorder (!%p292_p9), %s2296_s21, 63 }
   0xf   : > { %s4148_s16 = scalar_lea.hbm (!%p292_p9), %s4206_s9, %s2342_s27 }
  0x13   : > { %s4214_s21 = smov (!%p328_p10, %s2296_s21), 63  ;;  %vm367_vm0 = vcmask 261120  }
  0x14   : > { %s2297_s22 = sshll.u32 %s4214_s21, 3  ;;  %s2858_s21 = smov [#allocation2]  }
  0x15   : > { %s2963_s25 = scalar_lea.vmem %s4197_s0, %s2297_s22  ;;  %s324_s22 = sand.u32 1, %s2848_s10  }
  0x16   : > { %v2966_v0 = vld [vmem:[%s2963_s25] sm:$0xff]  ;;  %v2969_v1 = vld [vmem:[%s2963_s25 + $0x10] sm:$0xff]  ;;  %v2972_v2 = vld [vmem:[%s2963_s25 + $0x8] sm:$0xff]  ;;  %s2295_s23 = sshll.u32 %s324_s22, 8  ;;  %s4157_s13 = scalar_lea.sflag [#allocation3], %s324_s22 }
  0x17   : > { %v368_v3 = vsel %vm367_vm0, %v2966_v0, 0.0  ;;  %v374_v4 = vsel %vm367_vm0, %v2969_v1, 0.0  ;;  %v2979_v5 = vld [vmem:[%s2963_s25 + $0x18] sm:$0xff]  ;;  %v371_v6 = vsel %vm367_vm0, %v2972_v2, 0.0  ;;  %v2986_v8 = vld [vmem:[%s2963_s25 + $0x20] sm:$0xff]  ;;  %v2989_v9 = vld [vmem:[%s2963_s25 + $0x28] sm:$0xff] }
  0x18   : > { %369 = vadd.xlane.f32.xlu0 %v368_v3  ;;  %375 = vadd.xlane.f32.xlu1 %v374_v4  ;;  %v377_v7 = vsel %vm367_vm0, %v2979_v5, 0.0  ;;  %v380_v10 = vsel %vm367_vm0, %v2986_v8, 0.0  ;;  %v383_v11 = vsel %vm367_vm0, %v2989_v9, 0.0  ;;  %v2996_v12 = vld [vmem:[%s2963_s25 + $0x30] sm:$0xff]  ;;  %v2999_v13 = vld [vmem:[%s2963_s25 + $0x38] sm:$0xff]  ;;  %v3002_v14 = vld [vmem:[%s2963_s25 + $0x40] sm:$0xff] }
  0x19   : > { %v3005_v15 = vld [vmem:[%s2963_s25 + $0x48] sm:$0xff]  ;;  %v386_v16 = vsel %vm367_vm0, %v2996_v12, 0.0  ;;  %v389_v17 = vsel %vm367_vm0, %v2999_v13, 0.0  ;;  %v392_v18 = vsel %vm367_vm0, %v3002_v14, 0.0  ;;  %v3016_v20 = vld [vmem:[%s2963_s25 + $0x50] sm:$0xff]  ;;  %v3019_v21 = vld [vmem:[%s2963_s25 + $0x58] sm:$0xff] }
  0x1a   : > { %v395_v19 = vsel %vm367_vm0, %v3005_v15, 0.0  ;;  %v398_v22 = vsel %vm367_vm0, %v3016_v20, 0.0  ;;  %v401_v23 = vsel %vm367_vm0, %v3019_v21, 0.0  ;;  %v3026_v24 = vld [vmem:[%s2963_s25 + $0x60] sm:$0xff]  ;;  %v3029_v25 = vld [vmem:[%s2963_s25 + $0x68] sm:$0xff]  ;;  %v3036_v28 = vld [vmem:[%s2963_s25 + $0x70] sm:$0xff] }
  0x1b   : > { %v404_v26 = vsel %vm367_vm0, %v3026_v24, 0.0  ;;  %v407_v27 = vsel %vm367_vm0, %v3029_v25, 0.0  ;;  %v3039_v29 = vld [vmem:[%s2963_s25 + $0x78] sm:$0xff]  ;;  %v410_v30 = vsel %vm367_vm0, %v3036_v28, 0.0  ;;  %v3046_v32 = vld [vmem:[%s2963_s25 + $0x80] sm:$0xff]  ;;  %v3049_v33 = vld [vmem:[%s2963_s25 + $0x88] sm:$0xff] }
  0x1c   : > { %372 = vadd.xlane.f32.xlu0 %v371_v6  ;;  %378 = vadd.xlane.f32.xlu1 %v377_v7  ;;  %v413_v31 = vsel %vm367_vm0, %v3039_v29, 0.0  ;;  %v416_v34 = vsel %vm367_vm0, %v3046_v32, 0.0  ;;  %v419_v35 = vsel %vm367_vm0, %v3049_v33, 0.0  ;;  %v3056_v36 = vld [vmem:[%s2963_s25 + $0x90] sm:$0xff]  ;;  %v3059_v37 = vld [vmem:[%s2963_s25 + $0x98] sm:$0xff]  ;;  %v3066_v40 = vld [vmem:[%s2963_s25 + $0xa0] sm:$0xff] }
  0x1d   : > { %v422_v38 = vsel %vm367_vm0, %v3056_v36, 0.0  ;;  %v425_v39 = vsel %vm367_vm0, %v3059_v37, 0.0  ;;  %v3069_v41 = vld [vmem:[%s2963_s25 + $0xa8] sm:$0xff]  ;;  %v428_v42 = vsel %vm367_vm0, %v3066_v40, 0.0  ;;  %v3076_v44 = vld [vmem:[%s2963_s25 + $0xb0] sm:$0xff]  ;;  %v3079_v45 = vld [vmem:[%s2963_s25 + $0xb8] sm:$0xff] }
  0x1e   : > { %v431_v43 = vsel %vm367_vm0, %v3069_v41, 0.0  ;;  %v434_v46 = vsel %vm367_vm0, %v3076_v44, 0.0  ;;  %v437_v47 = vsel %vm367_vm0, %v3079_v45, 0.0  ;;  %v3086_v48 = vld [vmem:[%s2963_s25 + $0xc0] sm:$0xff]  ;;  %v3089_v49 = vld [vmem:[%s2963_s25 + $0xc8] sm:$0xff]  ;;  %v3096_v52 = vld [vmem:[%s2963_s25 + $0xd0] sm:$0xff] }
  0x1f   : > { %v440_v50 = vsel %vm367_vm0, %v3086_v48, 0.0  ;;  %v443_v51 = vsel %vm367_vm0, %v3089_v49, 0.0  ;;  %v3099_v53 = vld [vmem:[%s2963_s25 + $0xd8] sm:$0xff]  ;;  %v446_v54 = vsel %vm367_vm0, %v3096_v52, 0.0  ;;  %v3106_v56 = vld [vmem:[%s2963_s25 + $0xe0] sm:$0xff]  ;;  %v3109_v57 = vld [vmem:[%s2963_s25 + $0xe8] sm:$0xff] }
  0x20   : > { %381 = vadd.xlane.f32.xlu0 %v380_v10  ;;  %384 = vadd.xlane.f32.xlu1 %v383_v11  ;;  %v449_v55 = vsel %vm367_vm0, %v3099_v53, 0.0  ;;  %v452_v58 = vsel %vm367_vm0, %v3106_v56, 0.0  ;;  %v455_v59 = vsel %vm367_vm0, %v3109_v57, 0.0  ;;  %v3116_v60 = vld [vmem:[%s2963_s25 + $0xf0] sm:$0xff]  ;;  %v3119_v61 = vld [vmem:[%s2963_s25 + $0xf8] sm:$0xff]  ;;  %s4081_s26 = scalar_lea.vmem [#allocation2], %s2295_s23 }
  0x21   : > { %v458_v62 = vsel %vm367_vm0, %v3116_v60, 0.0  ;;  %v461_v63 = vsel %vm367_vm0, %v3119_v61, 0.0  ;;  %s2229_s28 = sshll.u32 %s4081_s26, 4  ;;  %s2800_s23 = sshll.u32 %s2858_s21, 4  ;;  %s4150_s28 = int_to_ptr.vmem [resolvable:$true] %s2229_s28  ;;  %s2801_s23 = int_to_ptr.vmem [resolvable:$false] %s2800_s23 }
  0x22   : > { %s2796_s17 = scalar_lea.vmem %s4150_s28, 4096  ;;  %s2802_s24 = scalar_lea.vmem %s2801_s23, 8192 }
  0x23   : > { %p2797_p11 = scmp.ne.s32.totalorder %s4150_s28, %s2796_s17  ;;  %p2803_p0 = scmp.lt.s32.totalorder %s4150_s28, %s2801_s23 }
  0x24   : > { %387 = vadd.xlane.f32.xlu0 %v386_v16  ;;  %390 = vadd.xlane.f32.xlu1 %v389_v17  ;;  %p2804_p1 = scmp.lt.s32.totalorder %s2802_s24, %s2796_s17 }
  0x25   : > { %p2798_p12 = pnand %p2797_p11, %p2949_p5 }
  0x26   : > { %p2805_p2 = por %p2804_p1, %p2803_p0 }
  0x27   : > { %p2799_p13 = pneg %p2798_p12 }
  0x28   : > { %393 = vadd.xlane.f32.xlu0 %v392_v18  ;;  %396 = vadd.xlane.f32.xlu1 %v395_v19 }
  0x29   : > { %p2806_p3 = pnand %p2805_p2, %p2799_p13 }
  0x2c   : > { %399 = vadd.xlane.f32.xlu0 %v398_v22  ;;  %402 = vadd.xlane.f32.xlu1 %v401_v23 }
  0x30   : > { %405 = vadd.xlane.f32.xlu0 %v404_v26  ;;  %408 = vadd.xlane.f32.xlu1 %v407_v27 }
  0x34   : > { %411 = vadd.xlane.f32.xlu0 %v410_v30  ;;  %414 = vadd.xlane.f32.xlu1 %v413_v31 }
  0x38   : > { %417 = vadd.xlane.f32.xlu0 %v416_v34  ;;  %420 = vadd.xlane.f32.xlu1 %v419_v35 }
  0x3c   : > { %423 = vadd.xlane.f32.xlu0 %v422_v38  ;;  %426 = vadd.xlane.f32.xlu1 %v425_v39 }
  0x40   : > { %429 = vadd.xlane.f32.xlu0 %v428_v42  ;;  %432 = vadd.xlane.f32.xlu1 %v431_v43 }
  0x44   : > { %435 = vadd.xlane.f32.xlu0 %v434_v46  ;;  %438 = vadd.xlane.f32.xlu1 %v437_v47 }
  0x48   : > { %441 = vadd.xlane.f32.xlu0 %v440_v50  ;;  %444 = vadd.xlane.f32.xlu1 %v443_v51 }
  0x4c   : > { %447 = vadd.xlane.f32.xlu0 %v446_v54  ;;  %450 = vadd.xlane.f32.xlu1 %v449_v55 }
  0x50   : > { %453 = vadd.xlane.f32.xlu0 %v452_v58  ;;  %456 = vadd.xlane.f32.xlu1 %v455_v59 }
  0x54   : > { %459 = vadd.xlane.f32.xlu0 %v458_v62  ;;  %462 = vadd.xlane.f32.xlu1 %v461_v63 }
  0xa1   : > { %v370_v3 = vpop.xlane.xlu0 %369  ;;  %v376_v4 = vpop.xlane.xlu1 %375 }
  0xa2   : > { %v465_v6 = vmul.f32 0.03125, %v370_v3  ;;  %v467_v7 = vmul.f32 0.03125, %v376_v4 }
  0xa4   : > { %v3126_v10 = vsub.f32 %v2966_v0, %v465_v6  ;;  %v3129_v11 = vsub.f32 %v2969_v1, %v467_v7 }
  0xa5   : > { %v373_v16 = vpop.xlane.xlu0 %372  ;;  %v379_v17 = vpop.xlane.xlu1 %378 }
  0xa6   : > { %v466_v18 = vmul.f32 0.03125, %v373_v16  ;;  %v468_v19 = vmul.f32 0.03125, %v379_v17  ;;  %v529_v22 = vmul.f32 %v3126_v10, %v3126_v10  ;;  %v531_v23 = vmul.f32 %v3129_v11, %v3129_v11 }
  0xa8   : > { %v3136_v26 = vsub.f32 %v2972_v2, %v466_v18  ;;  %v3139_v27 = vsub.f32 %v2979_v5, %v468_v19  ;;  %v561_v0 = vsel %vm367_vm0, %v529_v22, 0.0  ;;  %v567_v31 = vsel %vm367_vm0, %v531_v23, 0.0 }
  0xa9   : > { %562 = vadd.xlane.f32.xlu0 %v561_v0  ;;  %v382_v1 = vpop.xlane.xlu0 %381  ;;  %v385_v30 = vpop.xlane.xlu1 %384 }
  0xaa   : > { %v469_v34 = vmul.f32 0.03125, %v382_v1  ;;  %v470_v35 = vmul.f32 0.03125, %v385_v30  ;;  %v530_v38 = vmul.f32 %v3136_v26, %v3136_v26  ;;  %v532_v39 = vmul.f32 %v3139_v27, %v3139_v27 }
  0xac   : > { %v3148_v2 = vsub.f32 %v2986_v8, %v469_v34  ;;  %v3151_v5 = vsub.f32 %v2989_v9, %v470_v35  ;;  %v564_v42 = vsel %vm367_vm0, %v530_v38, 0.0  ;;  %v570_v47 = vsel %vm367_vm0, %v532_v39, 0.0 }
  0xad   : > { %568 = vadd.xlane.f32.xlu0 %v567_v31  ;;  %565 = vadd.xlane.f32.xlu1 %v564_v42  ;;  %v388_v43 = vpop.xlane.xlu0 %387  ;;  %v391_v46 = vpop.xlane.xlu1 %390 }
  0xae   : > { %v471_v50 = vmul.f32 0.03125, %v388_v43  ;;  %v472_v51 = vmul.f32 0.03125, %v391_v46  ;;  %v533_v54 = vmul.f32 %v3148_v2, %v3148_v2  ;;  %v534_v8 = vmul.f32 %v3151_v5, %v3151_v5 }
  0xb0   : > { %v3160_v55 = vsub.f32 %v2996_v12, %v471_v50  ;;  %v3163_v9 = vsub.f32 %v2999_v13, %v472_v51  ;;  %v573_v58 = vsel %vm367_vm0, %v533_v54, 0.0  ;;  %v576_v63 = vsel %vm367_vm0, %v534_v8, 0.0 }
  0xb1   : > { %571 = vadd.xlane.f32.xlu1 %v570_v47  ;;  %574 = vadd.xlane.f32.xlu0 %v573_v58  ;;  %v394_v59 = vpop.xlane.xlu0 %393  ;;  %v397_v62 = vpop.xlane.xlu1 %396 }
  0xb2   : > { %v473_v3 = vmul.f32 0.03125, %v394_v59  ;;  %v474_v4 = vmul.f32 0.03125, %v397_v62  ;;  %v535_v6 = vmul.f32 %v3160_v55, %v3160_v55  ;;  %v536_v12 = vmul.f32 %v3163_v9, %v3163_v9 }
  0xb4   : > { %v3172_v7 = vsub.f32 %v3002_v14, %v473_v3  ;;  %v3175_v13 = vsub.f32 %v3005_v15, %v474_v4  ;;  %v579_v16 = vsel %vm367_vm0, %v535_v6, 0.0  ;;  %v582_v19 = vsel %vm367_vm0, %v536_v12, 0.0 }
  0xb5   : > { %577 = vadd.xlane.f32.xlu1 %v576_v63  ;;  %580 = vadd.xlane.f32.xlu0 %v579_v16  ;;  %v400_v17 = vpop.xlane.xlu0 %399  ;;  %v403_v18 = vpop.xlane.xlu1 %402 }
  0xb6   : > { %v475_v22 = vmul.f32 0.03125, %v400_v17  ;;  %v476_v23 = vmul.f32 0.03125, %v403_v18  ;;  %v537_v0 = vmul.f32 %v3172_v7, %v3172_v7  ;;  %v538_v14 = vmul.f32 %v3175_v13, %v3175_v13 }
  0xb8   : > { %v3184_v1 = vsub.f32 %v3016_v20, %v475_v22  ;;  %v3187_v15 = vsub.f32 %v3019_v21, %v476_v23  ;;  %v585_v30 = vsel %vm367_vm0, %v537_v0, 0.0  ;;  %v588_v35 = vsel %vm367_vm0, %v538_v14, 0.0 }
  0xb9   : > { %583 = vadd.xlane.f32.xlu1 %v582_v19  ;;  %586 = vadd.xlane.f32.xlu0 %v585_v30  ;;  %v406_v31 = vpop.xlane.xlu0 %405  ;;  %v409_v34 = vpop.xlane.xlu1 %408 }
  0xba   : > { %v477_v38 = vmul.f32 0.03125, %v406_v31  ;;  %v478_v39 = vmul.f32 0.03125, %v409_v34  ;;  %v539_v42 = vmul.f32 %v3184_v1, %v3184_v1  ;;  %v540_v20 = vmul.f32 %v3187_v15, %v3187_v15 }
  0xbc   : > { %v3196_v43 = vsub.f32 %v3026_v24, %v477_v38  ;;  %v3199_v21 = vsub.f32 %v3029_v25, %v478_v39  ;;  %v591_v46 = vsel %vm367_vm0, %v539_v42, 0.0  ;;  %v594_v51 = vsel %vm367_vm0, %v540_v20, 0.0 }
  0xbd   : > { %589 = vadd.xlane.f32.xlu1 %v588_v35  ;;  %592 = vadd.xlane.f32.xlu0 %v591_v46  ;;  %v412_v47 = vpop.xlane.xlu0 %411  ;;  %v415_v50 = vpop.xlane.xlu1 %414 }
  0xbe   : > { %v479_v54 = vmul.f32 0.03125, %v412_v47  ;;  %v480_v8 = vmul.f32 0.03125, %v415_v50  ;;  %v541_v58 = vmul.f32 %v3196_v43, %v3196_v43  ;;  %v542_v24 = vmul.f32 %v3199_v21, %v3199_v21 }
  0xc0   : > { %v3208_v59 = vsub.f32 %v3036_v28, %v479_v54  ;;  %v3211_v25 = vsub.f32 %v3039_v29, %v480_v8  ;;  %v597_v62 = vsel %vm367_vm0, %v541_v58, 0.0  ;;  %v600_v4 = vsel %vm367_vm0, %v542_v24, 0.0 }
  0xc1   : > { %595 = vadd.xlane.f32.xlu1 %v594_v51  ;;  %598 = vadd.xlane.f32.xlu0 %v597_v62  ;;  %v418_v63 = vpop.xlane.xlu0 %417  ;;  %v421_v3 = vpop.xlane.xlu1 %420  ;;  %v2586_v51 = vld [vmem:[%s4200_s3 + $0x8] sm:$0xff]  }
  0xc2   : > { %v481_v6 = vmul.f32 0.03125, %v418_v63  ;;  %v482_v12 = vmul.f32 0.03125, %v421_v3  ;;  %v543_v16 = vmul.f32 %v3208_v59, %v3208_v59  ;;  %v544_v28 = vmul.f32 %v3211_v25, %v3211_v25  ;;  %2409 = vmatprep.subr.bf16.mxu0 %v2586_v51  ;;  %2541 = vmatprep.subr.bf16.mxu1 %v2586_v51 }
  0xc3   : > { %2410 = vmatpush3.bf16.msra.mxu0 %v2586_v51  ;;  %2543 = vmatpush3.bf16.msra.mxu1 %v2586_v51 }
  0xc4   : > { %v3220_v17 = vsub.f32 %v3046_v32, %v481_v6  ;;  %v3223_v29 = vsub.f32 %v3049_v33, %v482_v12  ;;  %v603_v18 = vsel %vm367_vm0, %v543_v16, 0.0  ;;  %v606_v23 = vsel %vm367_vm0, %v544_v28, 0.0  ;;  %v2587_v6 = vld [vmem:[%s4200_s3] sm:$0xff]  }
  0xc5   : > { %601 = vadd.xlane.f32.xlu1 %v600_v4  ;;  %604 = vadd.xlane.f32.xlu0 %v603_v18  ;;  %v424_v19 = vpop.xlane.xlu0 %423  ;;  %v427_v22 = vpop.xlane.xlu1 %426 }
  0xc6   : > { %v483_v0 = vmul.f32 0.03125, %v424_v19  ;;  %v484_v14 = vmul.f32 0.03125, %v427_v22  ;;  %v545_v30 = vmul.f32 %v3220_v17, %v3220_v17  ;;  %v546_v32 = vmul.f32 %v3223_v29, %v3223_v29  ;;  %2411 = vmatprep.subr.bf16.mxu0 %v2587_v6  ;;  %2542 = vmatprep.subr.bf16.mxu1 %v2587_v6 }
  0xc7   : > { %2412 = vmatpush3.bf16.msra.mxu0 %v2587_v6  ;;  %2544 = vmatpush3.bf16.msra.mxu1 %v2587_v6 }
  0xc8   : > { %v3232_v31 = vsub.f32 %v3056_v36, %v483_v0  ;;  %v3235_v33 = vsub.f32 %v3059_v37, %v484_v14  ;;  %v609_v34 = vsel %vm367_vm0, %v545_v30, 0.0  ;;  %v612_v39 = vsel %vm367_vm0, %v546_v32, 0.0 }
  0xc9   : > { %607 = vadd.xlane.f32.xlu1 %v606_v23  ;;  %610 = vadd.xlane.f32.xlu0 %v609_v34  ;;  %v430_v35 = vpop.xlane.xlu0 %429  ;;  %v433_v38 = vpop.xlane.xlu1 %432 }
  0xca   : > { %v485_v42 = vmul.f32 0.03125, %v430_v35  ;;  %v486_v20 = vmul.f32 0.03125, %v433_v38  ;;  %v547_v46 = vmul.f32 %v3232_v31, %v3232_v31  ;;  %v548_v36 = vmul.f32 %v3235_v33, %v3235_v33 }
  0xcc   : > { %v3244_v47 = vsub.f32 %v3066_v40, %v485_v42  ;;  %v3247_v37 = vsub.f32 %v3069_v41, %v486_v20  ;;  %v615_v50 = vsel %vm367_vm0, %v547_v46, 0.0  ;;  %v618_v58 = vsel %vm367_vm0, %v548_v36, 0.0 }
  0xcd   : > { %613 = vadd.xlane.f32.xlu1 %v612_v39  ;;  %616 = vadd.xlane.f32.xlu0 %v615_v50  ;;  %v436_v54 = vpop.xlane.xlu0 %435  ;;  %v439_v8 = vpop.xlane.xlu1 %438 }
  0xce   : > { %v487_v24 = vmul.f32 0.03125, %v436_v54  ;;  %v488_v62 = vmul.f32 0.03125, %v439_v8  ;;  %v549_v40 = vmul.f32 %v3244_v47, %v3244_v47  ;;  %v550_v41 = vmul.f32 %v3247_v37, %v3247_v37 }
  0xd0   : > { %v3259_v63 = vsub.f32 %v3076_v44, %v487_v24  ;;  %v3262_v3 = vsub.f32 %v3079_v45, %v488_v62  ;;  %v621_v4 = vsel %vm367_vm0, %v549_v40, 0.0  ;;  %v624_v28 = vsel %vm367_vm0, %v550_v41, 0.0 }
  0xd1   : > { %619 = vadd.xlane.f32.xlu1 %v618_v58  ;;  %622 = vadd.xlane.f32.xlu0 %v621_v4  ;;  %v442_v12 = vpop.xlane.xlu0 %441  ;;  %v445_v16 = vpop.xlane.xlu1 %444 }
  0xd2   : > { %v489_v18 = vmul.f32 0.03125, %v442_v12  ;;  %v490_v19 = vmul.f32 0.03125, %v445_v16  ;;  %v551_v44 = vmul.f32 %v3259_v63, %v3259_v63  ;;  %v552_v45 = vmul.f32 %v3262_v3, %v3262_v3 }
  0xd4   : > { %v3274_v22 = vsub.f32 %v3086_v48, %v489_v18  ;;  %v3277_v23 = vsub.f32 %v3089_v49, %v490_v19  ;;  %v627_v0 = vsel %vm367_vm0, %v551_v44, 0.0  ;;  %v630_v32 = vsel %vm367_vm0, %v552_v45, 0.0 }
  0xd5   : > { %625 = vadd.xlane.f32.xlu1 %v624_v28  ;;  %628 = vadd.xlane.f32.xlu0 %v627_v0  ;;  %v448_v14 = vpop.xlane.xlu0 %447  ;;  %v451_v30 = vpop.xlane.xlu1 %450 }
  0xd6   : > { %v491_v34 = vmul.f32 0.03125, %v448_v14  ;;  %v492_v35 = vmul.f32 0.03125, %v451_v30  ;;  %v553_v38 = vmul.f32 %v3274_v22, %v3274_v22  ;;  %v554_v48 = vmul.f32 %v3277_v23, %v3277_v23 }
  0xd8   : > { %v3286_v39 = vsub.f32 %v3096_v52, %v491_v34  ;;  %v3289_v49 = vsub.f32 %v3099_v53, %v492_v35  ;;  %v633_v42 = vsel %vm367_vm0, %v553_v38, 0.0  ;;  %v636_v36 = vsel %vm367_vm0, %v554_v48, 0.0 }
  0xd9   : > { %631 = vadd.xlane.f32.xlu1 %v630_v32  ;;  %634 = vadd.xlane.f32.xlu0 %v633_v42  ;;  %v454_v20 = vpop.xlane.xlu0 %453  ;;  %v457_v46 = vpop.xlane.xlu1 %456 }
  0xda   : > { %v493_v50 = vmul.f32 0.03125, %v454_v20  ;;  %v494_v51 = vmul.f32 0.03125, %v457_v46  ;;  %v555_v54 = vmul.f32 %v3286_v39, %v3286_v39  ;;  %v556_v52 = vmul.f32 %v3289_v49, %v3289_v49 }
  0xdc   : > { %v3298_v8 = vsub.f32 %v3106_v56, %v493_v50  ;;  %v3301_v53 = vsub.f32 %v3109_v57, %v494_v51  ;;  %v639_v58 = vsel %vm367_vm0, %v555_v54, 0.0  ;;  %v642_v40 = vsel %vm367_vm0, %v556_v52, 0.0 }
  0xdd   : > { %637 = vadd.xlane.f32.xlu1 %v636_v36  ;;  %640 = vadd.xlane.f32.xlu0 %v639_v58  ;;  %v460_v24 = vpop.xlane.xlu0 %459  ;;  %v463_v62 = vpop.xlane.xlu1 %462 }
  0xde   : > { %v495_v41 = vmul.f32 0.03125, %v460_v24  ;;  %v496_v4 = vmul.f32 0.03125, %v463_v62  ;;  %v557_v6 = vmul.f32 %v3298_v8, %v3298_v8  ;;  %v558_v56 = vmul.f32 %v3301_v53, %v3301_v53 }
  0xe0   : > { %v3310_v12 = vsub.f32 %v3116_v60, %v495_v41  ;;  %v3313_v57 = vsub.f32 %v3119_v61, %v496_v4  ;;  %v645_v16 = vsel %vm367_vm0, %v557_v6, 0.0  ;;  %v648_v28 = vsel %vm367_vm0, %v558_v56, 0.0 }
  0xe1   : > { %643 = vadd.xlane.f32.xlu1 %v642_v40  ;;  %646 = vadd.xlane.f32.xlu0 %v645_v16 }
  0xe2   : > { %v559_v18 = vmul.f32 %v3310_v12, %v3310_v12  ;;  %v560_v19 = vmul.f32 %v3313_v57, %v3313_v57 }
  0xe4   : > { %v651_v44 = vsel %vm367_vm0, %v559_v18, 0.0  ;;  %v654_v60 = vsel %vm367_vm0, %v560_v19, 0.0  ;;  %v3327_v19 = vld [vmem:[%s4198_s1] ss:$0 sm:$0xff] }
  0xe5   : > { %649 = vadd.xlane.f32.xlu1 %v648_v28  ;;  %652 = vadd.xlane.f32.xlu0 %v651_v44 }
  0xe9   : > { %655 = vadd.xlane.f32.xlu1 %v654_v60 }
 0x132   : > { %v563_v61 = vpop.xlane.xlu0 %562 }
 0x133   : > { %v657_v45 = vmul.f32 0.03125, %v563_v61 }
 0x135   : > { %v689_v0 = vadd.f32 1e-05, %v657_v45 }
 0x136   : > { %v566_v14 = vpop.xlane.xlu1 %565  ;;  %v569_v30 = vpop.xlane.xlu0 %568 }
 0x137   : > { %2604 = vrsqrt.f32 %v689_v0  ;;  %v658_v32 = vmul.f32 0.03125, %v566_v14  ;;  %v659_v34 = vmul.f32 0.03125, %v569_v30 }
 0x139   : > { %v690_v35 = vadd.f32 1e-05, %v658_v32  ;;  %v691_v38 = vadd.f32 1e-05, %v659_v34 }
 0x13a   : > { %v572_v48 = vpop.xlane.xlu1 %571  ;;  %v575_v42 = vpop.xlane.xlu0 %574 }
 0x13b   : > { %2606 = vrsqrt.f32 %v690_v35  ;;  %v660_v20 = vmul.f32 0.03125, %v572_v48  ;;  %v661_v46 = vmul.f32 0.03125, %v575_v42 }
 0x13c   : > { %2608 = vrsqrt.f32 %v691_v38 }
 0x13d   : > { %v692_v36 = vadd.f32 1e-05, %v660_v20  ;;  %v693_v50 = vadd.f32 1e-05, %v661_v46 }
 0x13e   : > { %v578_v51 = vpop.xlane.xlu1 %577  ;;  %v581_v54 = vpop.xlane.xlu0 %580 }
 0x13f   : > { %2610 = vrsqrt.f32 %v692_v36  ;;  %v662_v52 = vmul.f32 0.03125, %v578_v51  ;;  %v663_v58 = vmul.f32 0.03125, %v581_v54 }
 0x140   : > { %2612 = vrsqrt.f32 %v693_v50 }
 0x141   : > { %v694_v24 = vadd.f32 1e-05, %v662_v52  ;;  %v695_v62 = vadd.f32 1e-05, %v663_v58 }
 0x142   : > { %v584_v40 = vpop.xlane.xlu1 %583  ;;  %v587_v41 = vpop.xlane.xlu0 %586 }
 0x143   : > { %2614 = vrsqrt.f32 %v694_v24  ;;  %v664_v4 = vmul.f32 0.03125, %v584_v40  ;;  %v665_v6 = vmul.f32 0.03125, %v587_v41 }
 0x144   : > { %v2605_v56 = vpop.eup %2604  ;;  %2616 = vrsqrt.f32 %v695_v62 }
 0x145   : > { %v696_v16 = vadd.f32 1e-05, %v664_v4  ;;  %v697_v28 = vadd.f32 1e-05, %v665_v6  ;;  %v753_v18 = vmul.f32 %v2605_v56, %v3126_v10  ;;  %v3334_v10 = vld [vmem:[%s4199_s2] ss:$0 sm:$0xff] }
 0x146   : > { %v590_v44 = vpop.xlane.xlu1 %589  ;;  %v593_v60 = vpop.xlane.xlu0 %592 }
 0x147   : > { %2618 = vrsqrt.f32 %v696_v16  ;;  %v666_v61 = vmul.f32 0.03125, %v590_v44  ;;  %v667_v45 = vmul.f32 0.03125, %v593_v60  ;;  %v792_v14 = vmul.f32 %v3327_v19, %v753_v18 }
 0x148   : > { %v2607_v0 = vpop.eup %2606  ;;  %2620 = vrsqrt.f32 %v697_v28 }
 0x149   : > { %v2609_v30 = vpop.eup %2608  ;;  %v698_v32 = vadd.f32 1e-05, %v666_v61  ;;  %v699_v34 = vadd.f32 1e-05, %v667_v45  ;;  %v754_v35 = vmul.f32 %v2607_v0, %v3136_v26  ;;  %v831_v51 = vadd.f32 %v3334_v10, %v792_v14 }
 0x14a   : > { %v596_v38 = vpop.xlane.xlu1 %595  ;;  %v599_v48 = vpop.xlane.xlu0 %598  ;;  %v755_v42 = vmul.f32 %v2609_v30, %v3129_v11 }
 0x14b   : > { %2622 = vrsqrt.f32 %v698_v32  ;;  %v668_v20 = vmul.f32 0.03125, %v596_v38  ;;  %v669_v46 = vmul.f32 0.03125, %v599_v48  ;;  %v793_v36 = vmul.f32 %v3327_v19, %v754_v35 }
 0x14c   : > { %v2611_v50 = vpop.eup %2610  ;;  %2624 = vrsqrt.f32 %v699_v34  ;;  %v794_v11 = vmul.f32 %v3327_v19, %v755_v42 }
 0x14d   : > { %v2613_v54 = vpop.eup %2612  ;;  %v700_v26 = vadd.f32 1e-05, %v668_v20  ;;  %v701_v52 = vadd.f32 1e-05, %v669_v46  ;;  %v832_v58 = vadd.f32 %v3334_v10, %v793_v36  ;;  %v756_v24 = vmul.f32 %v2611_v50, %v3139_v27 }
 0x14e   : > { %v602_v62 = vpop.xlane.xlu1 %601  ;;  %v605_v40 = vpop.xlane.xlu0 %604  ;;  %v757_v41 = vmul.f32 %v2613_v54, %v3148_v2  ;;  %v833_v2 = vadd.f32 %v3334_v10, %v794_v11 }
 0x14f   : > { %2626 = vrsqrt.f32 %v700_v26  ;;  %v670_v4 = vmul.f32 0.03125, %v602_v62  ;;  %v671_v6 = vmul.f32 0.03125, %v605_v40  ;;  %v863_v56 = vpack.c.bf16 %v832_v58, %v831_v51 }
 0x150   : > { %v2615_v16 = vpop.eup %2614  ;;  %2628 = vrsqrt.f32 %v701_v52  ;;  %v795_v28 = vmul.f32 %v3327_v19, %v756_v24  ;;  %v796_v18 = vmul.f32 %v3327_v19, %v757_v41 }
 0x151   : > { %v2617_v44 = vpop.eup %2616  ;;  %v702_v60 = vadd.f32 1e-05, %v670_v4  ;;  %v703_v61 = vadd.f32 1e-05, %v671_v6  ;;  %2413 = vmatprep.mubr.msk.bf16.mxu0 %vm367_vm0, %v863_v56  ;;  %v758_v27 = vmul.f32 %v2615_v16, %v3151_v5 }
 0x152   : > { %v608_v45 = vpop.xlane.xlu1 %607  ;;  %v611_v0 = vpop.xlane.xlu0 %610  ;;  %v834_v14 = vadd.f32 %v3334_v10, %v795_v28  ;;  %v759_v30 = vmul.f32 %v2617_v44, %v3160_v55  ;;  %v835_v42 = vadd.f32 %v3334_v10, %v796_v18 }
 0x153   : > { %2630 = vrsqrt.f32 %v702_v60  ;;  %v672_v32 = vmul.f32 0.03125, %v608_v45  ;;  %v673_v34 = vmul.f32 0.03125, %v611_v0  ;;  %v797_v35 = vmul.f32 %v3327_v19, %v758_v27 }
 0x154   : > { %v2619_v38 = vpop.eup %2618  ;;  %2632 = vrsqrt.f32 %v703_v61  ;;  %v864_v48 = vpack.c.bf16 %v834_v14, %v833_v2  ;;  %v798_v54 = vmul.f32 %v3327_v19, %v759_v30 }
 0x155   : > { %v2621_v20 = vpop.eup %2620  ;;  %v704_v5 = vadd.f32 1e-05, %v672_v32  ;;  %v705_v46 = vadd.f32 1e-05, %v673_v34  ;;  %v836_v36 = vadd.f32 %v3334_v10, %v797_v35  ;;  %v760_v50 = vmul.f32 %v2619_v38, %v3163_v9 }
 0x156   : > { %2414 = vmatmul.mubr.msk.bf16.vlgmr.msra.gmra.mxu0 %vm367_vm0, %v864_v48  ;;  %v614_v55 = vpop.xlane.xlu1 %613  ;;  %v617_v51 = vpop.xlane.xlu0 %616  ;;  %v761_v26 = vmul.f32 %v2621_v20, %v3172_v7  ;;  %v837_v7 = vadd.f32 %v3334_v10, %v798_v54 }
 0x157   : > { %2634 = vrsqrt.f32 %v704_v5  ;;  %v674_v52 = vmul.f32 0.03125, %v614_v55  ;;  %v675_v58 = vmul.f32 0.03125, %v617_v51  ;;  %v865_v24 = vpack.c.bf16 %v836_v36, %v835_v42 }
 0x158   : > { %v2623_v62 = vpop.eup %2622  ;;  %2636 = vrsqrt.f32 %v705_v46  ;;  %v799_v40 = vmul.f32 %v3327_v19, %v760_v50  ;;  %v800_v11 = vmul.f32 %v3327_v19, %v761_v26 }
 0x159   : > { %v2625_v41 = vpop.eup %2624  ;;  %v706_v9 = vadd.f32 1e-05, %v674_v52  ;;  %v707_v4 = vadd.f32 1e-05, %v675_v58  ;;  %2417 = vmatprep.mubr.msk.bf16.mxu0 %vm367_vm0, %v865_v24  ;;  %v762_v6 = vmul.f32 %v2623_v62, %v3175_v13 }
 0x15a   : > { %v620_v56 = vpop.xlane.xlu1 %619  ;;  %v623_v16 = vpop.xlane.xlu0 %622  ;;  %v838_v28 = vadd.f32 %v3334_v10, %v799_v40  ;;  %v763_v18 = vmul.f32 %v2625_v41, %v3184_v1  ;;  %v839_v0 = vadd.f32 %v3334_v10, %v800_v11 }
 0x15b   : > { %2638 = vrsqrt.f32 %v706_v9  ;;  %v676_v44 = vmul.f32 0.03125, %v620_v56  ;;  %v677_v60 = vmul.f32 0.03125, %v623_v16  ;;  %v801_v61 = vmul.f32 %v3327_v19, %v762_v6 }
 0x15c   : > { %v2627_v27 = vpop.eup %2626  ;;  %2640 = vrsqrt.f32 %v707_v4  ;;  %v866_v45 = vpack.c.bf16 %v838_v28, %v837_v7  ;;  %v802_v35 = vmul.f32 %v3327_v19, %v763_v18 }
 0x15d   : > { %v2629_v2 = vpop.eup %2628  ;;  %v708_v13 = vadd.f32 1e-05, %v676_v44  ;;  %v709_v14 = vadd.f32 1e-05, %v677_v60  ;;  %v840_v30 = vadd.f32 %v3334_v10, %v801_v61  ;;  %v764_v32 = vmul.f32 %v2627_v27, %v3187_v15 }
 0x15e   : > { %2418 = vmatmul.mubr.msk.bf16.gmra.mxu0 %vm367_vm0, %v866_v45  ;;  %v626_v1 = vpop.xlane.xlu1 %625  ;;  %v629_v34 = vpop.xlane.xlu0 %628  ;;  %v765_v38 = vmul.f32 %v2629_v2, %v3196_v43  ;;  %v841_v43 = vadd.f32 %v3334_v10, %v802_v35 }
 0x15f   : > { %2642 = vrsqrt.f32 %v708_v13  ;;  %v678_v48 = vmul.f32 0.03125, %v626_v1  ;;  %v679_v42 = vmul.f32 0.03125, %v629_v34  ;;  %v867_v20 = vpack.c.bf16 %v840_v30, %v839_v0 }
 0x160   : > { %v2631_v5 = vpop.eup %2630  ;;  %2644 = vrsqrt.f32 %v709_v14  ;;  %v803_v46 = vmul.f32 %v3327_v19, %v764_v32  ;;  %v804_v36 = vmul.f32 %v3327_v19, %v765_v38 }
 0x161   : > { %v2633_v50 = vpop.eup %2632  ;;  %v710_v15 = vadd.f32 1e-05, %v678_v48  ;;  %v711_v55 = vadd.f32 1e-05, %v679_v42  ;;  %2421 = vmatprep.mubr.msk.bf16.mxu0 %vm367_vm0, %v867_v20  ;;  %v766_v51 = vmul.f32 %v2631_v5, %v3199_v21 }
 0x162   : > { %v632_v54 = vpop.xlane.xlu1 %631  ;;  %v635_v26 = vpop.xlane.xlu0 %634  ;;  %v842_v52 = vadd.f32 %v3334_v10, %v803_v46  ;;  %v767_v58 = vmul.f32 %v2633_v50, %v3208_v59  ;;  %v843_v9 = vadd.f32 %v3334_v10, %v804_v36 }
 0x163   : > { %2646 = vrsqrt.f32 %v710_v15  ;;  %v680_v24 = vmul.f32 0.03125, %v632_v54  ;;  %v681_v62 = vmul.f32 0.03125, %v635_v26  ;;  %v805_v40 = vmul.f32 %v3327_v19, %v766_v51 }
 0x164   : > { %v2635_v11 = vpop.eup %2634  ;;  %2648 = vrsqrt.f32 %v711_v55  ;;  %v868_v41 = vpack.c.bf16 %v842_v52, %v841_v43  ;;  %v806_v28 = vmul.f32 %v3327_v19, %v767_v58 }
 0x165   : > { %v2637_v4 = vpop.eup %2636  ;;  %v712_v21 = vadd.f32 1e-05, %v680_v24  ;;  %v713_v6 = vadd.f32 1e-05, %v681_v62  ;;  %v844_v56 = vadd.f32 %v3334_v10, %v805_v40  ;;  %v768_v16 = vmul.f32 %v2635_v11, %v3211_v25 }
 0x166   : > { %2422 = vmatmul.mubr.msk.bf16.gmra.mxu0 %vm367_vm0, %v868_v41  ;;  %v638_v59 = vpop.xlane.xlu1 %637  ;;  %v641_v7 = vpop.xlane.xlu0 %640  ;;  %v769_v18 = vmul.f32 %v2637_v4, %v3220_v17  ;;  %v845_v17 = vadd.f32 %v3334_v10, %v806_v28 }
 0x167   : > { %2650 = vrsqrt.f32 %v712_v21  ;;  %v682_v44 = vmul.f32 0.03125, %v638_v59  ;;  %v683_v60 = vmul.f32 0.03125, %v641_v7  ;;  %v869_v61 = vpack.c.bf16 %v844_v56, %v843_v9 }
 0x168   : > { %v2639_v27 = vpop.eup %2638  ;;  %2652 = vrsqrt.f32 %v713_v6  ;;  %v807_v45 = vmul.f32 %v3327_v19, %v768_v16  ;;  %v808_v0 = vmul.f32 %v3327_v19, %v769_v18 }
 0x169   : > { %v2641_v2 = vpop.eup %2640  ;;  %v714_v25 = vadd.f32 1e-05, %v682_v44  ;;  %v715_v13 = vadd.f32 1e-05, %v683_v60  ;;  %2425 = vmatprep.mubr.msk.bf16.mxu0 %vm367_vm0, %v869_v61  ;;  %v770_v14 = vmul.f32 %v2639_v27, %v3223_v29 }
 0x16a   : > { %v644_v30 = vpop.xlane.xlu1 %643  ;;  %v647_v32 = vpop.xlane.xlu0 %646  ;;  %v846_v1 = vadd.f32 %v3334_v10, %v807_v45  ;;  %v771_v34 = vmul.f32 %v2641_v2, %v3232_v31  ;;  %v847_v5 = vadd.f32 %v3334_v10, %v808_v0 }
 0x16b   : > { %2654 = vrsqrt.f32 %v714_v25  ;;  %v684_v35 = vmul.f32 0.03125, %v644_v30  ;;  %v685_v38 = vmul.f32 0.03125, %v647_v32  ;;  %v809_v48 = vmul.f32 %v3327_v19, %v770_v14 }
 0x16c   : > { %v2643_v42 = vpop.eup %2642  ;;  %2656 = vrsqrt.f32 %v715_v13  ;;  %v870_v20 = vpack.c.bf16 %v846_v1, %v845_v17  ;;  %v810_v51 = vmul.f32 %v3327_v19, %v771_v34 }
 0x16d   : > { %v2645_v46 = vpop.eup %2644  ;;  %v716_v29 = vadd.f32 1e-05, %v684_v35  ;;  %v717_v36 = vadd.f32 1e-05, %v685_v38  ;;  %v848_v50 = vadd.f32 %v3334_v10, %v809_v48  ;;  %v772_v15 = vmul.f32 %v2643_v42, %v3235_v33 }
 0x16e   : > { %2426 = vmatmul.mubr.msk.bf16.gmra.mxu0 %vm367_vm0, %v870_v20  ;;  %v650_v31 = vpop.xlane.xlu1 %649  ;;  %v653_v55 = vpop.xlane.xlu0 %652  ;;  %v773_v54 = vmul.f32 %v2645_v46, %v3244_v47  ;;  %v849_v47 = vadd.f32 %v3334_v10, %v810_v51 }
 0x16f   : > { %2658 = vrsqrt.f32 %v716_v29  ;;  %v686_v26 = vmul.f32 0.03125, %v650_v31  ;;  %v687_v43 = vmul.f32 0.03125, %v653_v55  ;;  %v871_v52 = vpack.c.bf16 %v848_v50, %v847_v5 }
 0x170   : > { %v2647_v58 = vpop.eup %2646  ;;  %2660 = vrsqrt.f32 %v717_v36  ;;  %v811_v24 = vmul.f32 %v3327_v19, %v772_v15  ;;  %v812_v62 = vmul.f32 %v3327_v19, %v773_v54 }
 0x171   : > { %v2649_v40 = vpop.eup %2648  ;;  %v718_v33 = vadd.f32 1e-05, %v686_v26  ;;  %v719_v11 = vadd.f32 1e-05, %v687_v43  ;;  %2429 = vmatprep.mubr.msk.bf16.mxu1 %vm367_vm0, %v871_v52  ;;  %v774_v41 = vmul.f32 %v2647_v58, %v3247_v37  ;;  %v2589_v58 = vld [vmem:[%s4202_s5 + $0x30] sm:$0xff]  }
 0x172   : > { %v656_v9 = vpop.xlane.xlu1 %655  ;;  %v850_v4 = vadd.f32 %v3334_v10, %v811_v24  ;;  %v775_v21 = vmul.f32 %v2649_v40, %v3259_v63  ;;  %v851_v7 = vadd.f32 %v3334_v10, %v812_v62  ;;  %v2592_v24 = vld [vmem:[%s4202_s5 + $0x18] sm:$0xff]   ;;  %v2593_v62 = vld [vmem:[%s4202_s5 + $0x10] sm:$0xff]   ;;  %v2594_v40 = vld [vmem:[%s4202_s5 + $0x8] sm:$0xff]  }
 0x173   : > { %2662 = vrsqrt.f32 %v718_v33  ;;  %v688_v6 = vmul.f32 0.03125, %v656_v9  ;;  %v813_v56 = vmul.f32 %v3327_v19, %v774_v41  ;;  %v2595_v33 = vld [vmem:[%s4202_s5] sm:$0xff]  }
 0x174   : > { %v2651_v16 = vpop.eup %2650  ;;  %2664 = vrsqrt.f32 %v719_v11  ;;  %v872_v59 = vpack.c.bf16 %v850_v4, %v849_v47  ;;  %v814_v60 = vmul.f32 %v3327_v19, %v775_v21  ;;  %v3472_v11 = vld [vmem:[%s4201_s4] ss:$0 sm:$0xff] }
 0x175   : > { %v2653_v28 = vpop.eup %2652  ;;  %v720_v18 = vadd.f32 1e-05, %v688_v6  ;;  %v852_v37 = vadd.f32 %v3334_v10, %v813_v56  ;;  %v776_v44 = vmul.f32 %v2651_v16, %v3262_v3 }
 0x176   : > { %2430 = vmatmul.mubr.msk.bf16.vlgmr.msra.gmra.mxu1 %vm367_vm0, %v872_v59  ;;  %v777_v63 = vmul.f32 %v2653_v28, %v3274_v22  ;;  %v853_v2 = vadd.f32 %v3334_v10, %v814_v60 }
 0x177   : > { %2666 = vrsqrt.f32 %v720_v18  ;;  %v873_v61 = vpack.c.bf16 %v852_v37, %v851_v7  ;;  %v815_v27 = vmul.f32 %v3327_v19, %v776_v44 }
 0x178   : > { %v2655_v45 = vpop.eup %2654  ;;  %v816_v13 = vmul.f32 %v3327_v19, %v777_v63 }
 0x179   : > { %v2657_v0 = vpop.eup %2656  ;;  %2433 = vmatprep.mubr.msk.bf16.mxu1 %vm367_vm0, %v873_v61  ;;  %v854_v25 = vadd.f32 %v3334_v10, %v815_v27  ;;  %v778_v3 = vmul.f32 %v2655_v45, %v3277_v23 }
 0x17a   : > { %v779_v14 = vmul.f32 %v2657_v0, %v3286_v39  ;;  %v855_v1 = vadd.f32 %v3334_v10, %v816_v13 }
 0x17b   : > { %v874_v30 = vpack.c.bf16 %v854_v25, %v853_v2  ;;  %v817_v22 = vmul.f32 %v3327_v19, %v778_v3 }
 0x17c   : > { %v2659_v32 = vpop.eup %2658  ;;  %v818_v38 = vmul.f32 %v3327_v19, %v779_v14 }
 0x17d   : > { %v2661_v17 = vpop.eup %2660  ;;  %v856_v34 = vadd.f32 %v3334_v10, %v817_v22  ;;  %v780_v35 = vmul.f32 %v2659_v32, %v3289_v49 }
 0x17e   : > { %2434 = vmatmul.mubr.msk.bf16.gmra.mxu1 %vm367_vm0, %v874_v30  ;;  %v781_v23 = vmul.f32 %v2661_v17, %v3298_v8  ;;  %v857_v5 = vadd.f32 %v3334_v10, %v818_v38 }
 0x17f   : > { %v875_v48 = vpack.c.bf16 %v856_v34, %v855_v1  ;;  %v819_v39 = vmul.f32 %v3327_v19, %v780_v35 }
 0x180   : > { %v2663_v42 = vpop.eup %2662  ;;  %v820_v49 = vmul.f32 %v3327_v19, %v781_v23 }
 0x181   : > { %v2665_v20 = vpop.eup %2664  ;;  %2437 = vmatprep.mubr.msk.bf16.mxu1 %vm367_vm0, %v875_v48  ;;  %v858_v46 = vadd.f32 %v3334_v10, %v819_v39  ;;  %v782_v29 = vmul.f32 %v2663_v42, %v3301_v53 }
 0x182   : > { %v783_v36 = vmul.f32 %v2665_v20, %v3310_v12  ;;  %v859_v31 = vadd.f32 %v3334_v10, %v820_v49 }
 0x183   : > { %v876_v50 = vpack.c.bf16 %v858_v46, %v857_v5  ;;  %v821_v8 = vmul.f32 %v3327_v19, %v782_v29 }
 0x184   : > { %v2667_v15 = vpop.eup %2666  ;;  %v822_v54 = vmul.f32 %v3327_v19, %v783_v36 }
 0x185   : > { %v860_v55 = vadd.f32 %v3334_v10, %v821_v8  ;;  %v784_v51 = vmul.f32 %v2667_v15, %v3313_v57  ;;  %v2588_v57 = vld [vmem:[%s4202_s5 + $0x38] sm:$0xff]  }
 0x186   : > { %2438 = vmatmul.mubr.msk.bf16.gmra.mxu1 %vm367_vm0, %v876_v50  ;;  %v861_v12 = vadd.f32 %v3334_v10, %v822_v54  ;;  %2445 = vmatprep.subr.bf16.mxu1 %v2588_v57 }
 0x187   : > { %v877_v26 = vpack.c.bf16 %v860_v55, %v859_v31  ;;  %v823_v53 = vmul.f32 %v3327_v19, %v784_v51  ;;  %2446 = vmatpush3.bf16.msra.mxu1 %v2588_v57  ;;  %v2590_v19 = vld [vmem:[%s4202_s5 + $0x28] sm:$0xff]  }
 0x188   : > { %2447 = vmatprep.subr.bf16.mxu1 %v2589_v58 }
 0x189   : > { %2441 = vmatprep.mubr.msk.bf16.mxu1 %vm367_vm0, %v877_v26  ;;  %v862_v43 = vadd.f32 %v3334_v10, %v823_v53  ;;  %v2591_v10 = vld [vmem:[%s4202_s5 + $0x20] sm:$0xff]  }
 0x18b   : > { %v878_v52 = vpack.c.bf16 %v862_v43, %v861_v12  ;;  %2448 = vmatpush3.bf16.msra.mxu1 %v2589_v58 }
 0x18c   : > { %2449 = vmatprep.subr.bf16.mxu1 %v2590_v19 }
 0x18e   : > { %2442 = vmatmul.mubr.msk.bf16.gmra.mxu1 %vm367_vm0, %v878_v52 }
 0x18f   : > { %2450 = vmatpush3.bf16.msra.mxu1 %v2590_v19 }
 0x190   : > { %2451 = vmatprep.subr.bf16.mxu1 %v2591_v10 }
 0x193   : > { %2452 = vmatpush3.bf16.msra.mxu1 %v2591_v10 }
 0x194   : > { %2453 = vmatprep.subr.bf16.mxu1 %v2592_v24 }
 0x197   : > { %2454 = vmatpush3.bf16.msra.mxu1 %v2592_v24 }
 0x198   : > { %2455 = vmatprep.subr.bf16.mxu1 %v2593_v62 }
 0x19b   : > { %2456 = vmatpush3.bf16.msra.mxu1 %v2593_v62 }
 0x19c   : > { %2457 = vmatprep.subr.bf16.mxu1 %v2594_v40 }
 0x19f   : > { %2458 = vmatpush3.bf16.msra.mxu1 %v2594_v40 }
 0x1a0   : > { %2459 = vmatprep.subr.bf16.mxu1 %v2595_v33 }
 0x1a3   : > { %2460 = vmatpush3.bf16.msra.mxu1 %v2595_v33 }
 0x216   : > { %v2415_v41 = vpop.f32.mrf.mxu0 }
 0x217   : > { %v3475_v9 = vadd.f32 %v2415_v41, %v3472_v11 }
 0x218   : > { %v984_v47 = vpop.f32.mrf.mxu0 }
 0x219   : > { %v1145_v4 = vmul.f32 0.044715, %v3475_v9  ;;  %v3479_v21 = vadd.f32 %v3472_v11, %v984_v47 }
 0x21a   : > { %v2416_v6 = vpop.f32.mrf.mxu0 }
 0x21b   : > { %v1177_v56 = vmul.f32 %v1145_v4, %v3475_v9  ;;  %v1143_v16 = vmul.f32 0.044715, %v3479_v21  ;;  %v3484_v59 = vadd.f32 %v2416_v6, %v3472_v11 }
 0x21c   : > { %v987_v7 = vpop.f32.mrf.mxu0 }
 0x21d   : > { %v1209_v28 = vmul.f32 %v1177_v56, %v3475_v9  ;;  %v1175_v18 = vmul.f32 %v1143_v16, %v3479_v21  ;;  %v1146_v37 = vmul.f32 0.044715, %v3484_v59  ;;  %v3490_v44 = vadd.f32 %v3472_v11, %v987_v7 }
 0x21e   : > { %v2419_v60 = vpop.f32.mrf.mxu0 }
 0x21f   : > { %v1241_v63 = vadd.f32 %v1209_v28, %v3475_v9  ;;  %v1207_v61 = vmul.f32 %v1175_v18, %v3479_v21  ;;  %v1178_v27 = vmul.f32 %v1146_v37, %v3484_v59  ;;  %v3496_v45 = vadd.f32 %v2419_v60, %v3472_v11 }
 0x220   : > { %v1144_v0 = vmul.f32 0.044715, %v3490_v44  ;;  %v1000_v2 = vpop.f32.mrf.mxu0  ;;  %v1113_v60 = vmul.f32 0.5, %v3475_v9  ;;  %v1112_v9 = vmul.f32 0.5, %v3490_v44 }
 0x221   : > { %v1273_v25 = vmul.f32 0.7978846, %v1241_v63  ;;  %v1210_v3 = vmul.f32 %v1178_v27, %v3484_v59  ;;  %v1149_v13 = vmul.f32 0.044715, %v3496_v45  ;;  %v3502_v14 = vadd.f32 %v3472_v11, %v1000_v2 }
 0x222   : > { %v1176_v30 = vmul.f32 %v1144_v0, %v3490_v44  ;;  %v2420_v22 = vpop.f32.mrf.mxu0  ;;  %v1239_v32 = vadd.f32 %v1207_v61, %v3479_v21  ;;  %v1111_v61 = vmul.f32 0.5, %v3479_v21  ;;  %v1114_v2 = vmul.f32 0.5, %v3484_v59 }
 0x223   : > { %v1242_v17 = vadd.f32 %v1210_v3, %v3484_v59  ;;  %v1181_v1 = vmul.f32 %v1149_v13, %v3496_v45  ;;  %v1147_v34 = vmul.f32 0.044715, %v3502_v14  ;;  %2668 = vtanh.f32 %v1273_v25 }
 0x224   : > { %v1208_v35 = vmul.f32 %v1176_v30, %v3490_v44  ;;  %v3511_v38 = vadd.f32 %v2420_v22, %v3472_v11  ;;  %v1003_v23 = vpop.f32.mrf.mxu0  ;;  %v1271_v48 = vmul.f32 0.7978846, %v1239_v32  ;;  %v3566_v59 = vmul.f32 0.5, %v3502_v14 }
 0x225   : > { %v1274_v39 = vmul.f32 0.7978846, %v1242_v17  ;;  %v1213_v42 = vmul.f32 %v1181_v1, %v3496_v45  ;;  %v1179_v20 = vmul.f32 %v1147_v34, %v3502_v14  ;;  %v3516_v5 = vadd.f32 %v3472_v11, %v1003_v23 }
 0x226   : > { %v1150_v46 = vmul.f32 0.044715, %v3511_v38  ;;  %v2423_v29 = vpop.f32.mrf.mxu0  ;;  %v1240_v49 = vadd.f32 %v1208_v35, %v3490_v44  ;;  %2670 = vtanh.f32 %v1271_v48  ;;  %v3569_v1 = vmul.f32 0.5, %v3496_v45 }
 0x227   : > { %2672 = vtanh.f32 %v1274_v39  ;;  %v1211_v36 = vmul.f32 %v1179_v20, %v3502_v14  ;;  %v1148_v50 = vmul.f32 0.044715, %v3516_v5  ;;  %v3523_v8 = vadd.f32 %v2423_v29, %v3472_v11 }
 0x228   : > { %v1182_v15 = vmul.f32 %v1150_v46, %v3511_v38  ;;  %v1016_v31 = vpop.f32.mrf.mxu0  ;;  %v1272_v55 = vmul.f32 0.7978846, %v1240_v49  ;;  %v1245_v51 = vadd.f32 %v1213_v42, %v3496_v45  ;;  %v3577_v39 = vmul.f32 0.5, %v3511_v38 }
 0x229   : > { %v1180_v54 = vmul.f32 %v1148_v50, %v3516_v5  ;;  %v1153_v26 = vmul.f32 0.044715, %v3523_v8  ;;  %v3530_v53 = vadd.f32 %v3472_v11, %v1016_v31  ;;  %v1243_v12 = vadd.f32 %v1211_v36, %v3502_v14 }
 0x22a   : > { %v1214_v43 = vmul.f32 %v1182_v15, %v3511_v38  ;;  %v2424_v52 = vpop.f32.mrf.mxu0  ;;  %2674 = vtanh.f32 %v1272_v55  ;;  %v1277_v57 = vmul.f32 0.7978846, %v1245_v51  ;;  %v3584_v46 = vmul.f32 0.5, %v3516_v5 }
 0x22b   : > { %v1212_v58 = vmul.f32 %v1180_v54, %v3516_v5  ;;  %v1185_v19 = vmul.f32 %v1153_v26, %v3523_v8  ;;  %v1151_v10 = vmul.f32 0.044715, %v3530_v53  ;;  %v3538_v24 = vadd.f32 %v2424_v52, %v3472_v11 }
 0x22c   : > { %v1019_v62 = vpop.f32.mrf.mxu0  ;;  %v1275_v40 = vmul.f32 0.7978846, %v1243_v12  ;;  %v1246_v33 = vadd.f32 %v1214_v43, %v3511_v38  ;;  %2676 = vtanh.f32 %v1277_v57  ;;  %v3590_v55 = vmul.f32 0.5, %v3523_v8 }
 0x22d   : > { %v1183_v41 = vmul.f32 %v1151_v10, %v3530_v53  ;;  %v1154_v47 = vmul.f32 0.044715, %v3538_v24  ;;  %v3544_v4 = vadd.f32 %v3472_v11, %v1019_v62  ;;  %v1244_v56 = vadd.f32 %v1212_v58, %v3516_v5 }
 0x22e   : > { %v2427_v6 = vpop.f32.mrf.mxu0  ;;  %2678 = vtanh.f32 %v1275_v40  ;;  %v1278_v16 = vmul.f32 0.7978846, %v1246_v33  ;;  %v1217_v7 = vmul.f32 %v1185_v19, %v3523_v8  ;;  %v3598_v19 = vmul.f32 0.5, %v3530_v53 }
 0x22f   : > { %v1215_v28 = vmul.f32 %v1183_v41, %v3530_v53  ;;  %v1186_v18 = vmul.f32 %v1154_v47, %v3538_v24  ;;  %v1152_v37 = vmul.f32 0.044715, %v3544_v4  ;;  %v1276_v27 = vmul.f32 0.7978846, %v1244_v56 }
 0x230   : > { %v1032_v63 = vpop.f32.mrf.mxu0  ;;  %2680 = vtanh.f32 %v1278_v16  ;;  %v2669_v0 = vpop.eup %2668  ;;  %v3556_v3 = vadd.f32 %v2427_v6, %v3472_v11  ;;  %v1249_v34 = vadd.f32 %v1217_v7, %v3523_v8 }
 0x231   : > { %v1184_v25 = vmul.f32 %v1152_v37, %v3544_v4  ;;  %v3559_v13 = vadd.f32 %v3472_v11, %v1032_v63  ;;  %v1218_v30 = vmul.f32 %v1186_v18, %v3538_v24  ;;  %2682 = vtanh.f32 %v1276_v27 }
 0x232   : > { %v2428_v22 = vpop.f32.mrf.mxu0  ;;  %v1247_v21 = vadd.f32 %v1215_v28, %v3530_v53  ;;  %v1157_v20 = vmul.f32 0.044715, %v3556_v3  ;;  %v1337_v31 = vadd.f32 1.0, %v2669_v0  ;;  %v1281_v51 = vmul.f32 0.7978846, %v1249_v34 }
 0x233   : > { %v2671_v32 = vpop.eup %2670  ;;  %v1216_v17 = vmul.f32 %v1184_v25, %v3544_v4  ;;  %v1155_v23 = vmul.f32 0.044715, %v3559_v13  ;;  %v3574_v48 = vadd.f32 %v2428_v22, %v3472_v11  ;;  %v1250_v50 = vadd.f32 %v1218_v30, %v3538_v24 }
 0x234   : > { %v2673_v35 = vpop.eup %2672  ;;  %v1035_v44 = vpop.f32.mrf.mxu0  ;;  %v1279_v42 = vmul.f32 0.7978846, %v1247_v21  ;;  %v1335_v45 = vadd.f32 1.0, %v2671_v32  ;;  %v1189_v47 = vmul.f32 %v1157_v20, %v3556_v3  ;;  %v1369_v16 = vmul.f32 %v1337_v31, %v1113_v60 }
 0x235   : > { %v3581_v14 = vadd.f32 %v3472_v11, %v1035_v44  ;;  %v1338_v49 = vadd.f32 1.0, %v2673_v35  ;;  %v1248_v36 = vadd.f32 %v1216_v17, %v3544_v4  ;;  %v1187_v54 = vmul.f32 %v1155_v23, %v3559_v13 }
 0x236   : > { %v2431_v29 = vpop.f32.mrf.mxu1  ;;  %2684 = vtanh.f32 %v1279_v42  ;;  %v1158_v5 = vmul.f32 0.044715, %v3574_v48  ;;  %v1367_v57 = vmul.f32 %v1335_v45, %v1111_v61  ;;  %v1282_v33 = vmul.f32 0.7978846, %v1250_v50 }
 0x237   : > { %v2675_v15 = vpop.eup %2674  ;;  %v1156_v38 = vmul.f32 0.044715, %v3581_v14  ;;  %v1280_v43 = vmul.f32 0.7978846, %v1248_v36  ;;  %v3595_v52 = vadd.f32 %v2431_v29, %v3472_v11  ;;  %v1370_v58 = vmul.f32 %v1338_v49, %v1114_v2 }
 0x238   : > { %v1048_v26 = vpop.f32.mrf.mxu1  ;;  %v1336_v12 = vadd.f32 1.0, %v2675_v15  ;;  %v1219_v53 = vmul.f32 %v1187_v54, %v3559_v13  ;;  %v1190_v7 = vmul.f32 %v1158_v5, %v3574_v48  ;;  %v3621_v17 = vmul.f32 0.5, %v3538_v24 }
 0x239   : > { %v2677_v10 = vpop.eup %2676  ;;  %v1188_v8 = vmul.f32 %v1156_v38, %v3581_v14  ;;  %2686 = vtanh.f32 %v1280_v43  ;;  %v3603_v6 = vadd.f32 %v3472_v11, %v1048_v26  ;;  %v1161_v63 = vmul.f32 0.044715, %v3595_v52 }
 0x23a   : > { %v2432_v62 = vpop.f32.mrf.mxu1  ;;  %v1368_v40 = vmul.f32 %v1336_v12, %v1112_v9  ;;  %2688 = vtanh.f32 %v1281_v51  ;;  %v1400_v27 = vpack.c.bf16 %v1370_v58, %v1369_v16  ;;  %v1341_v0 = vadd.f32 1.0, %v2677_v10 }
 0x23b   : > { %v2679_v41 = vpop.eup %2678  ;;  %v3606_v56 = vadd.f32 %v2432_v62, %v3472_v11  ;;  %v1220_v2 = vmul.f32 %v1188_v8, %v3581_v14  ;;  %2690 = vtanh.f32 %v1282_v33  ;;  %v1159_v9 = vmul.f32 0.044715, %v3603_v6 }
 0x23c   : > { %v1051_v28 = vpop.f32.mrf.mxu1  ;;  %v1399_v18 = vpack.c.bf16 %v1368_v40, %v1367_v57  ;;  %v1339_v60 = vadd.f32 1.0, %v2679_v41  ;;  %v1221_v34 = vmul.f32 %v1189_v47, %v3556_v3  ;;  %v1251_v42 = vadd.f32 %v1219_v53, %v3559_v13 }
 0x23d   : > { %v2681_v37 = vpop.eup %2680  ;;  %v3612_v61 = vadd.f32 %v3472_v11, %v1051_v28  ;;  %v1162_v21 = vmul.f32 0.044715, %v3606_v56  ;;  %v1222_v20 = vmul.f32 %v1190_v7, %v3574_v48  ;;  %v1193_v45 = vmul.f32 %v1161_v63, %v3595_v52 }
 0x23e   : > { %2461 = vmatprep.mubr.bf16.mxu1 %v1399_v18  ;;  %v2435_v25 = vpop.f32.mrf.mxu1  ;;  %v1342_v30 = vadd.f32 1.0, %v2681_v37  ;;  %v2683_v22 = vpop.eup %2682  ;;  %v1373_v29 = vmul.f32 %v1341_v0, %v3569_v1  ;;  %v1371_v24 = vmul.f32 %v1339_v60, %v3566_v59  ;;  %v1252_v15 = vadd.f32 %v1220_v2, %v3581_v14 }
 0x23f   : > { %v3618_v32 = vadd.f32 %v2435_v25, %v3472_v11  ;;  %2462 = vmatmul.mubr.bf16.vlgmr.msra.gmra.mxu1 %v1400_v27  ;;  %v1160_v35 = vmul.f32 0.044715, %v3612_v61  ;;  %v1340_v44 = vadd.f32 1.0, %v2683_v22  ;;  %v1283_v38 = vmul.f32 0.7978846, %v1251_v42 }
 0x240   : > { %v1064_v23 = vpop.f32.mrf.mxu1  ;;  %v1374_v49 = vmul.f32 %v1342_v30, %v3577_v39  ;;  %v1191_v51 = vmul.f32 %v1159_v9, %v3603_v6  ;;  %v1194_v54 = vmul.f32 %v1162_v21, %v3606_v56  ;;  %v1284_v59 = vmul.f32 0.7978846, %v1252_v15 }
 0x241   : > { %v1372_v50 = vmul.f32 %v1340_v44, %v3584_v46  ;;  %v1165_v5 = vmul.f32 0.044715, %v3618_v32  ;;  %v3637_v26 = vadd.f32 %v3472_v11, %v1064_v23  ;;  %v1192_v1 = vmul.f32 %v1160_v35, %v3612_v61 }
 0x242   : > { %v2436_v36 = vpop.f32.mrf.mxu1  ;;  %2692 = vtanh.f32 %v1283_v38  ;;  %v1402_v57 = vpack.c.bf16 %v1374_v49, %v1373_v29  ;;  %v3647_v10 = vmul.f32 %v1193_v45, %v3595_v52  ;;  %v1120_v62 = vmul.f32 0.5, %v3544_v4 }
 0x243   : > { %v2685_v31 = vpop.eup %2684  ;;  %v1401_v12 = vpack.c.bf16 %v1372_v50, %v1371_v24  ;;  %v3641_v46 = vadd.f32 %v2436_v36, %v3472_v11  ;;  %v3651_v40 = vmul.f32 0.5, %v3559_v13  ;;  %2694 = vtanh.f32 %v1284_v59 }
 0x244   : > { %v1067_v39 = vpop.f32.mrf.mxu1  ;;  %v1343_v58 = vadd.f32 1.0, %v2685_v31  ;;  %v1223_v41 = vmul.f32 %v1191_v51, %v3603_v6  ;;  %v1197_v47 = vmul.f32 %v1165_v5, %v3618_v32  ;;  %v1163_v16 = vmul.f32 0.044715, %v3637_v26 }
 0x245   : > { %v3644_v43 = vadd.f32 %v3472_v11, %v1067_v39  ;;  %2465 = vmatprep.mubr.bf16.mxu1 %v1401_v12  ;;  %v3657_v53 = vmul.f32 0.5, %v3581_v14  ;;  %v3660_v7 = vmul.f32 %v1194_v54, %v3606_v56  ;;  %v1253_v13 = vadd.f32 %v1221_v34, %v3556_v3 }
 0x246   : > { %v2439_v8 = vpop.f32.mrf.mxu1  ;;  %v2687_v33 = vpop.eup %2686  ;;  %v1254_v18 = vadd.f32 %v1222_v20, %v3574_v48  ;;  %v1224_v63 = vmul.f32 %v1192_v1, %v3612_v61  ;;  %v1166_v27 = vmul.f32 0.044715, %v3641_v46  ;;  %v1375_v2 = vmul.f32 %v1343_v58, %v3598_v19 }
 0x247   : > { %2466 = vmatmul.mubr.bf16.gmra.mxu1 %v1402_v57  ;;  %v1344_v4 = vadd.f32 1.0, %v2687_v33  ;;  %v2689_v37 = vpop.eup %2688  ;;  %v1164_v0 = vmul.f32 0.044715, %v3644_v43  ;;  %v1285_v30 = vmul.f32 0.7978846, %v1253_v13  ;;  %v3669_v21 = vmul.f32 %v1197_v47, %v3618_v32 }
 0x248   : > { %v1080_v28 = vpop.f32.mrf.mxu1  ;;  %v1345_v60 = vadd.f32 1.0, %v2689_v37  ;;  %v1286_v22 = vmul.f32 0.7978846, %v1254_v18  ;;  %v2691_v9 = vpop.eup %2690  ;;  %v1195_v34 = vmul.f32 %v1163_v16, %v3637_v26  ;;  %v3673_v35 = vadd.f32 %v2439_v8, %v3472_v11 }
 0x249   : > { %v1376_v25 = vmul.f32 %v1344_v4, %v1120_v62  ;;  %v3676_v23 = vmul.f32 0.5, %v3556_v3  ;;  %v3679_v44 = vadd.f32 %v3472_v11, %v1080_v28  ;;  %v1346_v20 = vadd.f32 1.0, %v2691_v9 }
 0x24a   : > { %v2440_v14 = vpop.f32.mrf.mxu1  ;;  %2696 = vtanh.f32 %v1285_v30  ;;  %v1198_v45 = vmul.f32 %v1166_v27, %v3641_v46  ;;  %v1196_v29 = vmul.f32 %v1164_v0, %v3644_v43  ;;  %v1377_v24 = vmul.f32 %v1345_v60, %v3590_v55 }
 0x24b   : > { %v1403_v42 = vpack.c.bf16 %v1376_v25, %v1375_v2  ;;  %v3684_v49 = vadd.f32 %v2440_v14, %v3472_v11  ;;  %v1378_v50 = vmul.f32 %v1346_v20, %v3621_v17  ;;  %2698 = vtanh.f32 %v1286_v22 }
 0x24c   : > { %v1083_v19 = vpop.f32.mrf.mxu1  ;;  %v1255_v15 = vadd.f32 %v1223_v41, %v3603_v6  ;;  %v1227_v38 = vmul.f32 %v1195_v34, %v3637_v26  ;;  %v1169_v31 = vmul.f32 0.044715, %v3673_v35  ;;  %v3695_v51 = vmul.f32 0.5, %v3574_v48 }
 0x24d   : > { %v3687_v36 = vadd.f32 %v3472_v11, %v1083_v19  ;;  %2469 = vmatprep.mubr.bf16.mxu1 %v1403_v42  ;;  %v3698_v54 = vmul.f32 0.5, %v3603_v6  ;;  %v1167_v5 = vmul.f32 0.044715, %v3679_v44  ;;  %v1404_v1 = vpack.c.bf16 %v1378_v50, %v1377_v24 }
 0x24e   : > { %v2443_v3 = vpop.f32.mrf.mxu1  ;;  %v1256_v55 = vadd.f32 %v1224_v63, %v3612_v61  ;;  %v1287_v17 = vmul.f32 0.7978846, %v1255_v15  ;;  %v1230_v59 = vmul.f32 %v1198_v45, %v3641_v46  ;;  %v1170_v57 = vmul.f32 0.044715, %v3684_v49 }
 0x24f   : > { %v2693_v12 = vpop.eup %2692  ;;  %v1168_v58 = vmul.f32 0.044715, %v3687_v36  ;;  %v1228_v6 = vmul.f32 %v1196_v29, %v3644_v43  ;;  %2470 = vmatmul.mubr.bf16.gmra.mxu1 %v1404_v1  ;;  %v1201_v47 = vmul.f32 %v1169_v31, %v3673_v35  ;;  %v3711_v16 = vadd.f32 %v2443_v3, %v3472_v11 }
 0x250   : > { %v1096_v39 = vpop.f32.mrf.mxu1  ;;  %v1347_v62 = vadd.f32 1.0, %v2693_v12  ;;  %v1288_v33 = vmul.f32 0.7978846, %v1256_v55  ;;  %2700 = vtanh.f32 %v1287_v17  ;;  %v2695_v41 = vpop.eup %2694  ;;  %v1199_v13 = vmul.f32 %v1167_v5, %v3679_v44 }
 0x251   : > { %v3706_v48 = vadd.f32 %v3472_v11, %v1096_v39  ;;  %v1348_v37 = vadd.f32 1.0, %v2695_v41  ;;  %v1257_v63 = vadd.f32 %v3647_v10, %v3595_v52  ;;  %v1202_v27 = vmul.f32 %v1170_v57, %v3684_v49 }
 0x252   : > { %v2444_v8 = vpop.f32.mrf.mxu1  ;;  %2702 = vtanh.f32 %v1288_v33  ;;  %v1200_v0 = vmul.f32 %v1168_v58, %v3687_v36  ;;  %v1379_v25 = vmul.f32 %v1347_v62, %v3651_v40  ;;  %v1258_v30 = vadd.f32 %v3660_v7, %v3606_v56 }
 0x253   : > { %v1171_v28 = vmul.f32 0.044715, %v3706_v48  ;;  %v3715_v4 = vadd.f32 %v2444_v8, %v3472_v11  ;;  %v1380_v60 = vmul.f32 %v1348_v37, %v3657_v53  ;;  %v1289_v22 = vmul.f32 0.7978846, %v1257_v63 }
 0x254   : > { %v1099_v18 = vpop.f32.mrf.mxu1  ;;  %v1233_v9 = vmul.f32 %v1201_v47, %v3673_v35  ;;  %v1173_v10 = vmul.f32 0.044715, %v3711_v16  ;;  %v1290_v20 = vmul.f32 0.7978846, %v1258_v30  ;;  %v1231_v53 = vmul.f32 %v1199_v13, %v3679_v44 }
 0x255   : > { %v1174_v2 = vmul.f32 0.044715, %v3715_v4  ;;  %v3724_v14 = vadd.f32 %v3472_v11, %v1099_v18  ;;  %v1203_v34 = vmul.f32 %v1171_v28, %v3706_v48  ;;  %v1405_v42 = vpack.c.bf16 %v1380_v60, %v1379_v25 }
 0x256   : > { %2704 = vtanh.f32 %v1289_v22  ;;  %v1259_v11 = vadd.f32 %v1227_v38, %v3637_v26  ;;  %v1234_v45 = vmul.f32 %v1202_v27, %v3684_v49  ;;  %v1260_v29 = vadd.f32 %v1228_v6, %v3644_v43 }
 0x257   : > { %v1172_v19 = vmul.f32 0.044715, %v3724_v14  ;;  %v2697_v40 = vpop.eup %2696  ;;  %v1206_v7 = vmul.f32 %v1174_v2, %v3715_v4  ;;  %v1232_v3 = vmul.f32 %v1200_v0, %v3687_v36  ;;  %2473 = vmatprep.mubr.bf16.mxu1 %v1405_v42  ;;  %2706 = vtanh.f32 %v1290_v20 }
 0x258   : > { %v1349_v24 = vadd.f32 1.0, %v2697_v40  ;;  %v1291_v50 = vmul.f32 0.7978846, %v1259_v11  ;;  %v2699_v15 = vpop.eup %2698  ;;  %v1292_v5 = vmul.f32 0.7978846, %v1260_v29  ;;  %v1261_v38 = vadd.f32 %v3669_v21, %v3618_v32 }
 0x259   : > { %v1204_v31 = vmul.f32 %v1172_v19, %v3724_v14  ;;  %v1262_v1 = vadd.f32 %v1230_v59, %v3641_v46  ;;  %v1205_v39 = vmul.f32 %v1173_v10, %v3711_v16  ;;  %v1235_v55 = vmul.f32 %v1203_v34, %v3706_v48 }
 0x25a   : > { %v1350_v17 = vadd.f32 1.0, %v2699_v15  ;;  %2708 = vtanh.f32 %v1291_v50  ;;  %v1238_v12 = vmul.f32 %v1206_v7, %v3715_v4  ;;  %v1293_v57 = vmul.f32 0.7978846, %v1261_v38 }
 0x25b   : > { %2710 = vtanh.f32 %v1292_v5  ;;  %v1294_v58 = vmul.f32 0.7978846, %v1262_v1  ;;  %v1381_v6 = vmul.f32 %v1349_v24, %v3676_v23  ;;  %v1263_v62 = vadd.f32 %v1231_v53, %v3679_v44 }
 0x25c   : > { %v1382_v8 = vmul.f32 %v1350_v17, %v3695_v51  ;;  %v1264_v21 = vadd.f32 %v1232_v3, %v3687_v36  ;;  %v1236_v33 = vmul.f32 %v1204_v31, %v3724_v14  ;;  %2712 = vtanh.f32 %v1293_v57 }
 0x25d   : > { %v2701_v59 = vpop.eup %2700  ;;  %v1265_v41 = vadd.f32 %v1233_v9, %v3673_v35  ;;  %v1266_v47 = vadd.f32 %v1234_v45, %v3684_v49  ;;  %2714 = vtanh.f32 %v1294_v58  ;;  %v1295_v18 = vmul.f32 0.7978846, %v1263_v62 }
 0x25e   : > { %v1406_v28 = vpack.c.bf16 %v1382_v8, %v1381_v6  ;;  %v1351_v13 = vadd.f32 1.0, %v2701_v59  ;;  %v1296_v23 = vmul.f32 0.7978846, %v1264_v21  ;;  %v1267_v27 = vadd.f32 %v1235_v55, %v3706_v48 }
 0x25f   : > { %v2703_v37 = vpop.eup %2702  ;;  %v1297_v63 = vmul.f32 0.7978846, %v1265_v41  ;;  %v1298_v51 = vmul.f32 0.7978846, %v1266_v47  ;;  %v1237_v0 = vmul.f32 %v1205_v39, %v3711_v16  ;;  %v1128_v2 = vmul.f32 0.5, %v3612_v61 }
 0x260   : > { %2474 = vmatmul.mubr.bf16.gmra.mxu1 %v1406_v28  ;;  %v1352_v25 = vadd.f32 1.0, %v2703_v37  ;;  %2716 = vtanh.f32 %v1295_v18  ;;  %v1268_v60 = vadd.f32 %v1236_v33, %v3724_v14  ;;  %v1299_v30 = vmul.f32 0.7978846, %v1267_v27 }
 0x261   : > { %2718 = vtanh.f32 %v1296_v23  ;;  %v1383_v22 = vmul.f32 %v1351_v13, %v3698_v54  ;;  %v1270_v19 = vadd.f32 %v1238_v12, %v3715_v4  ;;  %v1269_v61 = vadd.f32 %v1237_v0, %v3711_v16 }
 0x262   : > { %v1384_v9 = vmul.f32 %v1352_v25, %v1128_v2  ;;  %2720 = vtanh.f32 %v1297_v63  ;;  %v1300_v34 = vmul.f32 0.7978846, %v1268_v60  ;;  %v1129_v40 = vmul.f32 0.5, %v3595_v52 }
 0x263   : > { %v2705_v10 = vpop.eup %2704  ;;  %2722 = vtanh.f32 %v1298_v51  ;;  %v1130_v53 = vmul.f32 0.5, %v3606_v56  ;;  %v1302_v45 = vmul.f32 0.7978846, %v1270_v19  ;;  %v1301_v15 = vmul.f32 0.7978846, %v1269_v61 }
 0x264   : > { %v1407_v42 = vpack.c.bf16 %v1384_v9, %v1383_v22  ;;  %v1353_v20 = vadd.f32 1.0, %v2705_v10  ;;  %2724 = vtanh.f32 %v1299_v30  ;;  %v2707_v11 = vpop.eup %2706  ;;  %v1131_v31 = vmul.f32 0.5, %v3637_v26 }
 0x265   : > { %2726 = vtanh.f32 %v1300_v34  ;;  %v1354_v54 = vadd.f32 1.0, %v2707_v11  ;;  %v1132_v5 = vmul.f32 0.5, %v3644_v43  ;;  %v1134_v56 = vmul.f32 0.5, %v3641_v46 }
 0x266   : > { %2477 = vmatprep.mubr.bf16.mxu1 %v1407_v42  ;;  %v1385_v3 = vmul.f32 %v1353_v20, %v1129_v40  ;;  %2728 = vtanh.f32 %v1302_v45  ;;  %v1133_v26 = vmul.f32 0.5, %v3618_v32  ;;  %v1135_v59 = vmul.f32 0.5, %v3679_v44  ;;  %v2601_v45 = vld [vmem:[%s4204_s7 + $0x10] sm:$0xff]  }
 0x267   : > { %v2709_v7 = vpop.eup %2708  ;;  %v1386_v24 = vmul.f32 %v1354_v54, %v1130_v53  ;;  %2730 = vtanh.f32 %v1301_v15  ;;  %v1136_v33 = vmul.f32 0.5, %v3687_v36  ;;  %v1140_v32 = vmul.f32 0.5, %v3724_v14  ;;  %v2597_v53 = vld [vmem:[%s4204_s7 + $0x30] sm:$0xff]   ;;  %v2600_v54 = vld [vmem:[%s4204_s7 + $0x18] sm:$0xff]  }
 0x268   : > { %v2711_v29 = vpop.eup %2710  ;;  %v1355_v50 = vadd.f32 1.0, %v2709_v7  ;;  %v1138_v2 = vmul.f32 0.5, %v3684_v49  ;;  %v1139_v36 = vmul.f32 0.5, %v3706_v48  ;;  %v1137_v60 = vmul.f32 0.5, %v3673_v35  ;;  %v2596_v35 = vld [vmem:[%s4204_s7 + $0x38] sm:$0xff]   ;;  %v2602_v7 = vld [vmem:[%s4204_s7 + $0x8] sm:$0xff]  }
 0x269   : > { %v1356_v38 = vadd.f32 1.0, %v2711_v29  ;;  %v2713_v1 = vpop.eup %2712  ;;  %v1408_v39 = vpack.c.bf16 %v1386_v24, %v1385_v3  ;;  %v1142_v20 = vmul.f32 0.5, %v3715_v4  ;;  %v1141_v49 = vmul.f32 0.5, %v3711_v16  ;;  %2493 = vmatprep.subr.bf16.mxu0 %v2596_v35  ;;  %v2598_v4 = vld [vmem:[%s4204_s7 + $0x28] sm:$0xff]   ;;  %v2599_v16 = vld [vmem:[%s4204_s7 + $0x20] sm:$0xff]  }
 0x26a   : > { %v2715_v55 = vpop.eup %2714  ;;  %v1387_v52 = vmul.f32 %v1355_v50, %v1131_v31  ;;  %v1357_v12 = vadd.f32 1.0, %v2713_v1  ;;  %2494 = vmatpush3.bf16.msra.mxu0 %v2596_v35  ;;  %v2603_v29 = vld [vmem:[%s4204_s7] sm:$0xff]  }
 0x26b   : > { %v1388_v17 = vmul.f32 %v1356_v38, %v1132_v5  ;;  %2478 = vmatmul.mubr.bf16.gmra.mxu1 %v1408_v39  ;;  %v1358_v57 = vadd.f32 1.0, %v2715_v55  ;;  %2495 = vmatprep.subr.bf16.mxu0 %v2597_v53  ;;  %v3802_v3 = vld [vmem:[%s4203_s6] ss:$0 sm:$0xff] }
 0x26c   : > { %v1389_v28 = vmul.f32 %v1357_v12, %v1133_v26 }
 0x26d   : > { %v2717_v58 = vpop.eup %2716  ;;  %v1409_v6 = vpack.c.bf16 %v1388_v17, %v1387_v52  ;;  %v1390_v62 = vmul.f32 %v1358_v57, %v1134_v56 }
 0x26e   : > { %v2719_v8 = vpop.eup %2718  ;;  %v1359_v43 = vadd.f32 1.0, %v2717_v58  ;;  %2496 = vmatpush3.bf16.msra.mxu0 %v2597_v53 }
 0x26f   : > { %v2721_v21 = vpop.eup %2720  ;;  %2481 = vmatprep.mubr.bf16.mxu1 %v1409_v6  ;;  %v1360_v41 = vadd.f32 1.0, %v2719_v8  ;;  %v1410_v23 = vpack.c.bf16 %v1390_v62, %v1389_v28  ;;  %2497 = vmatprep.subr.bf16.mxu0 %v2598_v4 }
 0x270   : > { %v2723_v47 = vpop.eup %2722  ;;  %v1391_v13 = vmul.f32 %v1359_v43, %v1135_v59  ;;  %v1361_v44 = vadd.f32 1.0, %v2721_v21 }
 0x271   : > { %v2725_v46 = vpop.eup %2724  ;;  %v1392_v18 = vmul.f32 %v1360_v41, %v1136_v33  ;;  %v1362_v63 = vadd.f32 1.0, %v2723_v47 }
 0x272   : > { %v2727_v37 = vpop.eup %2726  ;;  %v1363_v27 = vadd.f32 1.0, %v2725_v46  ;;  %v1393_v10 = vmul.f32 %v1361_v44, %v1137_v60  ;;  %2498 = vmatpush3.bf16.msra.mxu0 %v2598_v4 }
 0x273   : > { %v1411_v51 = vpack.c.bf16 %v1392_v18, %v1391_v13  ;;  %v1364_v0 = vadd.f32 1.0, %v2727_v37  ;;  %2482 = vmatmul.mubr.bf16.gmra.mxu1 %v1410_v23  ;;  %v1394_v30 = vmul.f32 %v1362_v63, %v1138_v2  ;;  %v2729_v22 = vpop.eup %2728  ;;  %2499 = vmatprep.subr.bf16.mxu0 %v2599_v16 }
 0x274   : > { %v1395_v9 = vmul.f32 %v1363_v27, %v1139_v36  ;;  %v2731_v34 = vpop.eup %2730  ;;  %v1366_v14 = vadd.f32 1.0, %v2729_v22 }
 0x275   : > { %2485 = vmatprep.mubr.bf16.mxu1 %v1411_v51  ;;  %v1396_v25 = vmul.f32 %v1364_v0, %v1140_v32  ;;  %v1412_v42 = vpack.c.bf16 %v1394_v30, %v1393_v10  ;;  %v1365_v61 = vadd.f32 1.0, %v2731_v34 }
 0x276   : > { %v1398_v11 = vmul.f32 %v1366_v14, %v1142_v20  ;;  %2500 = vmatpush3.bf16.msra.mxu0 %v2599_v16 }
 0x277   : > { %v1413_v19 = vpack.c.bf16 %v1396_v25, %v1395_v9  ;;  %v1397_v48 = vmul.f32 %v1365_v61, %v1141_v49  ;;  %2501 = vmatprep.subr.bf16.mxu0 %v2600_v54 }
 0x279   : > { %v1414_v40 = vpack.c.bf16 %v1398_v11, %v1397_v48 }
 0x27a   : > { %2502 = vmatpush3.bf16.msra.mxu0 %v2600_v54 }
 0x27b   : > { %2486 = vmatmul.mubr.bf16.gmra.mxu1 %v1412_v42  ;;  %2503 = vmatprep.subr.bf16.mxu0 %v2601_v45 }
 0x27c   : > { %2489 = vmatprep.mubr.bf16.mxu1 %v1413_v19 }
 0x27e   : > { %2504 = vmatpush3.bf16.msra.mxu0 %v2601_v45 }
 0x27f   : > { %2505 = vmatprep.subr.bf16.mxu0 %v2602_v7 }
 0x282   : > { %2506 = vmatpush3.bf16.msra.mxu0 %v2602_v7 }
 0x283   : > { %2490 = vmatmul.mubr.bf16.gmra.mxu1 %v1414_v40  ;;  %2507 = vmatprep.subr.bf16.mxu0 %v2603_v29 }
 0x286   : > { %2508 = vmatpush3.bf16.msra.mxu0 %v2603_v29 }
 0x2ff   : > { %v2463_v24 = vpop.f32.mrf.mxu1 }
 0x300   : > { %v3805_v50 = vadd.f32 %v2463_v24, %v3802_v3 }
 0x301   : > { %v1520_v15 = vpop.f32.mrf.mxu1 }
 0x302   : > { %v1681_v31 = vmul.f32 0.044715, %v3805_v50  ;;  %v3809_v5 = vadd.f32 %v3802_v3, %v1520_v15 }
 0x303   : > { %v2464_v38 = vpop.f32.mrf.mxu1 }
 0x304   : > { %v1713_v1 = vmul.f32 %v1681_v31, %v3805_v50  ;;  %v1679_v39 = vmul.f32 0.044715, %v3809_v5  ;;  %v3814_v55 = vadd.f32 %v2464_v38, %v3802_v3 }
 0x305   : > { %v1523_v52 = vpop.f32.mrf.mxu1 }
 0x306   : > { %v1745_v17 = vmul.f32 %v1713_v1, %v3805_v50  ;;  %v1711_v56 = vmul.f32 %v1679_v39, %v3809_v5  ;;  %v1682_v12 = vmul.f32 0.044715, %v3814_v55  ;;  %v3820_v57 = vadd.f32 %v3802_v3, %v1523_v52 }
 0x307   : > { %v2467_v58 = vpop.f32.mrf.mxu1 }
 0x308   : > { %v1777_v6 = vadd.f32 %v1745_v17, %v3805_v50  ;;  %v1743_v8 = vmul.f32 %v1711_v56, %v3809_v5  ;;  %v1714_v26 = vmul.f32 %v1682_v12, %v3814_v55  ;;  %v3826_v62 = vadd.f32 %v2467_v58, %v3802_v3 }
 0x309   : > { %v1680_v43 = vmul.f32 0.044715, %v3820_v57  ;;  %v1536_v21 = vpop.f32.mrf.mxu1 }
 0x30a   : > { %v1809_v59 = vmul.f32 0.7978846, %v1777_v6  ;;  %v1746_v33 = vmul.f32 %v1714_v26, %v3814_v55  ;;  %v1685_v41 = vmul.f32 0.044715, %v3826_v62  ;;  %v3832_v47 = vadd.f32 %v3802_v3, %v1536_v21 }
 0x30b   : > { %v1712_v28 = vmul.f32 %v1680_v43, %v3820_v57  ;;  %v2468_v46 = vpop.f32.mrf.mxu1  ;;  %v1775_v13 = vadd.f32 %v1743_v8, %v3809_v5 }
 0x30c   : > { %v1778_v18 = vadd.f32 %v1746_v33, %v3814_v55  ;;  %v1717_v37 = vmul.f32 %v1685_v41, %v3826_v62  ;;  %v1683_v23 = vmul.f32 0.044715, %v3832_v47  ;;  %2732 = vtanh.f32 %v1809_v59 }
 0x30d   : > { %v1744_v63 = vmul.f32 %v1712_v28, %v3820_v57  ;;  %v3841_v51 = vadd.f32 %v2468_v46, %v3802_v3  ;;  %v1539_v32 = vpop.f32.mrf.mxu1  ;;  %v1807_v27 = vmul.f32 0.7978846, %v1775_v13 }
 0x30e   : > { %v1810_v0 = vmul.f32 0.7978846, %v1778_v18  ;;  %v1749_v2 = vmul.f32 %v1717_v37, %v3826_v62  ;;  %v1715_v44 = vmul.f32 %v1683_v23, %v3832_v47  ;;  %v3846_v36 = vadd.f32 %v3802_v3, %v1539_v32 }
 0x30f   : > { %v1686_v25 = vmul.f32 0.044715, %v3841_v51  ;;  %v1776_v60 = vadd.f32 %v1744_v63, %v3820_v57  ;;  %2734 = vtanh.f32 %v1807_v27  ;;  %v2471_v42 = vpop.f32.mrf.mxu1  ;;  %v1650_v23 = vmul.f32 0.5, %v3814_v55 }
 0x310   : > { %2736 = vtanh.f32 %v1810_v0  ;;  %v1747_v30 = vmul.f32 %v1715_v44, %v3832_v47  ;;  %v1684_v22 = vmul.f32 0.044715, %v3846_v36  ;;  %v1781_v34 = vadd.f32 %v1749_v2, %v3826_v62 }
 0x311   : > { %v1718_v9 = vmul.f32 %v1686_v25, %v3841_v51  ;;  %v1808_v10 = vmul.f32 0.7978846, %v1776_v60  ;;  %v3858_v61 = vadd.f32 %v2471_v42, %v3802_v3  ;;  %v1552_v11 = vpop.f32.mrf.mxu1  ;;  %v1647_v63 = vmul.f32 0.5, %v3809_v5 }
 0x312   : > { %v1716_v19 = vmul.f32 %v1684_v22, %v3846_v36  ;;  %v1779_v14 = vadd.f32 %v1747_v30, %v3832_v47  ;;  %v1813_v40 = vmul.f32 0.7978846, %v1781_v34  ;;  %v3863_v53 = vadd.f32 %v3802_v3, %v1552_v11 }
 0x313   : > { %v1750_v20 = vmul.f32 %v1718_v9, %v3841_v51  ;;  %2738 = vtanh.f32 %v1808_v10  ;;  %v1689_v35 = vmul.f32 0.044715, %v3858_v61  ;;  %v2472_v16 = vpop.f32.mrf.mxu1  ;;  %v1648_v32 = vmul.f32 0.5, %v3820_v57 }
 0x314   : > { %v1748_v49 = vmul.f32 %v1716_v19, %v3846_v36  ;;  %v1811_v48 = vmul.f32 0.7978846, %v1779_v14  ;;  %v1687_v7 = vmul.f32 0.044715, %v3863_v53  ;;  %v3870_v29 = vadd.f32 %v2472_v16, %v3802_v3 }
 0x315   : > { %v1782_v4 = vadd.f32 %v1750_v20, %v3841_v51  ;;  %v1721_v45 = vmul.f32 %v1689_v35, %v3858_v61  ;;  %v1555_v15 = vpop.f32.mrf.mxu1  ;;  %v1649_v25 = vmul.f32 0.5, %v3805_v50  ;;  %v1653_v16 = vmul.f32 0.5, %v3826_v62 }
 0x316   : > { %v1780_v54 = vadd.f32 %v1748_v49, %v3846_v36  ;;  %2740 = vtanh.f32 %v1811_v48  ;;  %v1719_v1 = vmul.f32 %v1687_v7, %v3863_v53  ;;  %v1690_v39 = vmul.f32 0.044715, %v3870_v29 }
 0x317   : > { %v1814_v24 = vmul.f32 0.7978846, %v1782_v4  ;;  %2742 = vtanh.f32 %v1813_v40  ;;  %v1753_v38 = vmul.f32 %v1721_v45, %v3858_v61  ;;  %v3876_v52 = vadd.f32 %v3802_v3, %v1555_v15 }
 0x318   : > { %v1812_v31 = vmul.f32 0.7978846, %v1780_v54  ;;  %v1751_v56 = vmul.f32 %v1719_v1, %v3863_v53  ;;  %v1722_v12 = vmul.f32 %v1690_v39, %v3870_v29  ;;  %v1651_v7 = vmul.f32 0.5, %v3832_v47 }
 0x319   : > { %v2733_v17 = vpop.eup %2732  ;;  %v1688_v58 = vmul.f32 0.044715, %v3876_v52  ;;  %v1785_v8 = vadd.f32 %v1753_v38, %v3858_v61 }
 0x31a   : > { %2744 = vtanh.f32 %v1812_v31  ;;  %v1754_v43 = vmul.f32 %v1722_v12, %v3870_v29  ;;  %v1783_v59 = vadd.f32 %v1751_v56, %v3863_v53  ;;  %v1873_v27 = vadd.f32 1.0, %v2733_v17 }
 0x31b   : > { %2746 = vtanh.f32 %v1814_v24  ;;  %v1720_v21 = vmul.f32 %v1688_v58, %v3876_v52  ;;  %v1817_v41 = vmul.f32 0.7978846, %v1785_v8  ;;  %v1652_v24 = vmul.f32 0.5, %v3846_v36 }
 0x31c   : > { %v2735_v6 = vpop.eup %2734  ;;  %v1815_v13 = vmul.f32 0.7978846, %v1783_v59  ;;  %v1786_v18 = vadd.f32 %v1754_v43, %v3870_v29  ;;  %v1905_v57 = vmul.f32 %v1873_v27, %v1649_v25  ;;  %v1654_v12 = vmul.f32 0.5, %v3841_v51 }
 0x31d   : > { %v2737_v26 = vpop.eup %2736  ;;  %v1752_v28 = vmul.f32 %v1720_v21, %v3876_v52  ;;  %v1871_v46 = vadd.f32 1.0, %v2735_v6  ;;  %2748 = vtanh.f32 %v1817_v41 }
 0x31e   : > { %v1874_v33 = vadd.f32 1.0, %v2737_v26  ;;  %v1818_v44 = vmul.f32 0.7978846, %v1786_v18  ;;  %2750 = vtanh.f32 %v1815_v13 }
 0x31f   : > { %v1784_v2 = vadd.f32 %v1752_v28, %v3876_v52  ;;  %v1903_v55 = vmul.f32 %v1871_v46, %v1647_v63  ;;  %v1657_v63 = vmul.f32 0.5, %v3858_v61 }
 0x320   : > { %v2739_v37 = vpop.eup %2738  ;;  %v2475_v60 = vpop.f32.mrf.mxu1  ;;  %v1906_v30 = vmul.f32 %v1874_v33, %v1650_v23  ;;  %2752 = vtanh.f32 %v1818_v44 }
 0x321   : > { %v1872_v0 = vadd.f32 1.0, %v2739_v37  ;;  %v3893_v9 = vadd.f32 %v2475_v60, %v3802_v3  ;;  %v1816_v5 = vmul.f32 0.7978846, %v1784_v2  ;;  %v1658_v2 = vmul.f32 0.5, %v3870_v29 }
 0x322   : > { %v1568_v34 = vpop.f32.mrf.mxu1  ;;  %v1936_v49 = vpack.c.bf16 %v1906_v30, %v1905_v57 }
 0x323   : > { %v2741_v22 = vpop.eup %2740  ;;  %v1904_v10 = vmul.f32 %v1872_v0, %v1648_v32  ;;  %v1693_v42 = vmul.f32 0.044715, %v3893_v9  ;;  %v3897_v14 = vadd.f32 %v3802_v3, %v1568_v34  ;;  %2754 = vtanh.f32 %v1816_v5 }
 0x324   : > { %v2743_v19 = vpop.eup %2742  ;;  %v2476_v20 = vpop.f32.mrf.mxu1  ;;  %v1875_v11 = vadd.f32 1.0, %v2741_v22  ;;  %v1655_v0 = vmul.f32 0.5, %v3863_v53 }
 0x325   : > { %v1935_v50 = vpack.c.bf16 %v1904_v10, %v1903_v55  ;;  %v1725_v40 = vmul.f32 %v1693_v42, %v3893_v9  ;;  %v1691_v35 = vmul.f32 0.044715, %v3897_v14  ;;  %v3902_v4 = vadd.f32 %v2476_v20, %v3802_v3 }
 0x326   : > { %v1571_v45 = vpop.f32.mrf.mxu1  ;;  %v1877_v31 = vadd.f32 1.0, %v2743_v19  ;;  %v1907_v56 = vmul.f32 %v1875_v11, %v1651_v7  ;;  %v1656_v20 = vmul.f32 0.5, %v3876_v52 }
 0x327   : > { %v2745_v48 = vpop.eup %2744  ;;  %2509 = vmatprep.mubr.bf16.mxu0 %v1935_v50  ;;  %v1757_v38 = vmul.f32 %v1725_v40, %v3893_v9  ;;  %v1723_v1 = vmul.f32 %v1691_v35, %v3897_v14  ;;  %v1694_v39 = vmul.f32 0.044715, %v3902_v4  ;;  %v3911_v17 = vadd.f32 %v3802_v3, %v1571_v45 }
 0x328   : > { %v2747_v54 = vpop.eup %2746  ;;  %2510 = vmatmul.mubr.bf16.vlgmr.msra.gmra.mxu0 %v1936_v49  ;;  %v1876_v15 = vadd.f32 1.0, %v2745_v48  ;;  %v1909_v26 = vmul.f32 %v1877_v31, %v1653_v16 }
 0x329   : > { %v1878_v58 = vadd.f32 1.0, %v2747_v54  ;;  %v1755_v47 = vmul.f32 %v1723_v1, %v3897_v14  ;;  %v1726_v36 = vmul.f32 %v1694_v39, %v3902_v4  ;;  %v1692_v6 = vmul.f32 0.044715, %v3911_v17 }
 0x32a   : > { %v1908_v62 = vmul.f32 %v1876_v15, %v1652_v24  ;;  %v1789_v21 = vadd.f32 %v1757_v38, %v3893_v9  ;;  %v2749_v28 = vpop.eup %2748 }
 0x32b   : > { %v1910_v43 = vmul.f32 %v1878_v58, %v1654_v12  ;;  %v1758_v59 = vmul.f32 %v1726_v36, %v3902_v4  ;;  %v1724_v33 = vmul.f32 %v1692_v6, %v3911_v17  ;;  %v1787_v41 = vadd.f32 %v1755_v47, %v3897_v14  ;;  %v2479_v51 = vpop.f32.mrf.mxu1  ;;  %v2751_v18 = vpop.eup %2750 }
 0x32c   : > { %v1937_v8 = vpack.c.bf16 %v1908_v62, %v1907_v56  ;;  %v1821_v13 = vmul.f32 0.7978846, %v1789_v21  ;;  %v3923_v23 = vadd.f32 %v2479_v51, %v3802_v3  ;;  %v1881_v22 = vadd.f32 1.0, %v2749_v28 }
 0x32d   : > { %v1938_v46 = vpack.c.bf16 %v1910_v43, %v1909_v26  ;;  %v1756_v37 = vmul.f32 %v1724_v33, %v3911_v17  ;;  %v1819_v32 = vmul.f32 0.7978846, %v1787_v41  ;;  %v1584_v27 = vpop.f32.mrf.mxu1  ;;  %v1790_v44 = vadd.f32 %v1758_v59, %v3902_v4  ;;  %v2753_v25 = vpop.eup %2752 }
 0x32e   : > { %2513 = vmatprep.mubr.bf16.mxu0 %v1937_v8  ;;  %2756 = vtanh.f32 %v1821_v13  ;;  %v1697_v60 = vmul.f32 0.044715, %v3923_v23  ;;  %v3931_v30 = vadd.f32 %v3802_v3, %v1584_v27  ;;  %v1879_v10 = vadd.f32 1.0, %v2751_v18 }
 0x32f   : > { %v1788_v55 = vadd.f32 %v1756_v37, %v3911_v17  ;;  %v2480_v61 = vpop.f32.mrf.mxu1  ;;  %v1882_v5 = vadd.f32 1.0, %v2753_v25  ;;  %2758 = vtanh.f32 %v1819_v32  ;;  %v1822_v34 = vmul.f32 0.7978846, %v1790_v44 }
 0x330   : > { %2514 = vmatmul.mubr.bf16.gmra.mxu0 %v1938_v46  ;;  %v2755_v53 = vpop.eup %2754  ;;  %v1729_v29 = vmul.f32 %v1697_v60, %v3923_v23  ;;  %v1695_v57 = vmul.f32 0.044715, %v3931_v30  ;;  %v3937_v19 = vadd.f32 %v2480_v61, %v3802_v3  ;;  %v1911_v45 = vmul.f32 %v1879_v10, %v1655_v0 }
 0x331   : > { %v1820_v42 = vmul.f32 0.7978846, %v1788_v55  ;;  %v1587_v50 = vpop.f32.mrf.mxu1  ;;  %v1880_v49 = vadd.f32 1.0, %v2755_v53  ;;  %v1914_v11 = vmul.f32 %v1882_v5, %v1658_v2  ;;  %2760 = vtanh.f32 %v1822_v34 }
 0x332   : > { %v1761_v48 = vmul.f32 %v1729_v29, %v3923_v23  ;;  %v1727_v40 = vmul.f32 %v1695_v57, %v3931_v30  ;;  %v1698_v35 = vmul.f32 0.044715, %v3937_v19  ;;  %v3944_v16 = vadd.f32 %v3802_v3, %v1587_v50 }
 0x333   : > { %v2483_v54 = vpop.f32.mrf.mxu1  ;;  %v1912_v7 = vmul.f32 %v1880_v49, %v1656_v20  ;;  %v1913_v24 = vmul.f32 %v1881_v22, %v1657_v63  ;;  %2762 = vtanh.f32 %v1820_v42  ;;  %v1661_v6 = vmul.f32 0.5, %v3893_v9 }
 0x334   : > { %v1759_v15 = vmul.f32 %v1727_v40, %v3931_v30  ;;  %v1730_v52 = vmul.f32 %v1698_v35, %v3937_v19  ;;  %v1696_v31 = vmul.f32 0.044715, %v3944_v16  ;;  %v3950_v38 = vadd.f32 %v2483_v54, %v3802_v3 }
 0x335   : > { %v1600_v1 = vpop.f32.mrf.mxu1  ;;  %v1939_v39 = vpack.c.bf16 %v1912_v7, %v1911_v45  ;;  %v1793_v56 = vadd.f32 %v1761_v48, %v3923_v23  ;;  %v1940_v47 = vpack.c.bf16 %v1914_v11, %v1913_v24  ;;  %v1659_v28 = vmul.f32 0.5, %v3897_v14 }
 0x336   : > { %v1762_v62 = vmul.f32 %v1730_v52, %v3937_v19  ;;  %v1728_v12 = vmul.f32 %v1696_v31, %v3944_v16  ;;  %v3956_v58 = vadd.f32 %v3802_v3, %v1600_v1  ;;  %v1791_v8 = vadd.f32 %v1759_v15, %v3931_v30 }
 0x337   : > { %v2484_v36 = vpop.f32.mrf.mxu1  ;;  %2517 = vmatprep.mubr.bf16.mxu0 %v1939_v39  ;;  %v1825_v26 = vmul.f32 0.7978846, %v1793_v56  ;;  %v1701_v21 = vmul.f32 0.044715, %v3950_v38  ;;  %v1662_v63 = vmul.f32 0.5, %v3902_v4  ;;  %v1660_v27 = vmul.f32 0.5, %v3911_v17 }
 0x338   : > { %v1760_v43 = vmul.f32 %v1728_v12, %v3944_v16  ;;  %v1699_v59 = vmul.f32 0.044715, %v3956_v58  ;;  %v3964_v33 = vadd.f32 %v2484_v36, %v3802_v3  ;;  %2518 = vmatmul.mubr.bf16.gmra.mxu0 %v1940_v47  ;;  %v1823_v51 = vmul.f32 0.7978846, %v1791_v8 }
 0x339   : > { %v1603_v41 = vpop.f32.mrf.mxu1  ;;  %v1794_v46 = vadd.f32 %v1762_v62, %v3937_v19  ;;  %2764 = vtanh.f32 %v1825_v26  ;;  %v1733_v44 = vmul.f32 %v1701_v21, %v3950_v38  ;;  %v3979_v60 = vmul.f32 0.5, %v3931_v30 }
 0x33a   : > { %v1731_v13 = vmul.f32 %v1699_v59, %v3956_v58  ;;  %v1702_v18 = vmul.f32 0.044715, %v3964_v33  ;;  %v3971_v37 = vadd.f32 %v3802_v3, %v1603_v41  ;;  %v1792_v0 = vadd.f32 %v1760_v43, %v3944_v16 }
 0x33b   : > { %v2757_v9 = vpop.eup %2756  ;;  %v2487_v32 = vpop.f32.mrf.mxu1  ;;  %2766 = vtanh.f32 %v1823_v51  ;;  %v1826_v14 = vmul.f32 0.7978846, %v1794_v46  ;;  %v3982_v22 = vmul.f32 0.5, %v3923_v23  ;;  %v3994_v42 = vmul.f32 0.5, %v3937_v19 }
 0x33c   : > { %v2759_v2 = vpop.eup %2758  ;;  %v1700_v25 = vmul.f32 0.044715, %v3971_v37  ;;  %v1763_v4 = vmul.f32 %v1731_v13, %v3956_v58  ;;  %v1885_v61 = vadd.f32 1.0, %v2757_v9  ;;  %v1824_v17 = vmul.f32 0.7978846, %v1792_v0 }
 0x33d   : > { %v1616_v55 = vpop.f32.mrf.mxu1  ;;  %2768 = vtanh.f32 %v1826_v14  ;;  %v1734_v5 = vmul.f32 %v1702_v18, %v3964_v33  ;;  %v3988_v53 = vadd.f32 %v2487_v32, %v3802_v3  ;;  %v1883_v23 = vadd.f32 1.0, %v2759_v2 }
 0x33e   : > { %v2761_v10 = vpop.eup %2760  ;;  %v1732_v34 = vmul.f32 %v1700_v25, %v3971_v37  ;;  %v3991_v30 = vadd.f32 %v3802_v3, %v1616_v55  ;;  %2770 = vtanh.f32 %v1824_v17  ;;  %v4002_v48 = vmul.f32 0.5, %v3944_v16 }
 0x33f   : > { %v2488_v29 = vpop.f32.mrf.mxu1  ;;  %v1886_v57 = vadd.f32 1.0, %v2761_v10  ;;  %v1765_v40 = vmul.f32 %v1733_v44, %v3950_v38  ;;  %v1917_v45 = vmul.f32 %v1885_v61, %v1661_v6  ;;  %v1795_v7 = vadd.f32 %v1763_v4, %v3956_v58 }
 0x340   : > { %v2763_v50 = vpop.eup %2762  ;;  %v1764_v20 = vmul.f32 %v1732_v34, %v3971_v37  ;;  %v1703_v49 = vmul.f32 0.044715, %v3991_v30  ;;  %v3999_v11 = vadd.f32 %v2488_v29, %v3802_v3  ;;  %v1766_v19 = vmul.f32 %v1734_v5, %v3964_v33 }
 0x341   : > { %v1619_v35 = vpop.f32.mrf.mxu1  ;;  %v1884_v54 = vadd.f32 1.0, %v2763_v50  ;;  %v1705_v24 = vmul.f32 0.044715, %v3988_v53  ;;  %v1918_v52 = vmul.f32 %v1886_v57, %v1662_v63  ;;  %v1915_v1 = vmul.f32 %v1883_v23, %v1659_v28 }
 0x342   : > { %v4009_v15 = vadd.f32 %v3802_v3, %v1619_v35  ;;  %v1796_v16 = vadd.f32 %v1764_v20, %v3971_v37  ;;  %v1827_v56 = vmul.f32 0.7978846, %v1795_v7  ;;  %v1735_v62 = vmul.f32 %v1703_v49, %v3991_v30 }
 0x343   : > { %v2491_v31 = vpop.f32.mrf.mxu1  ;;  %v1916_v39 = vmul.f32 %v1884_v54, %v1660_v27  ;;  %v1706_v12 = vmul.f32 0.044715, %v3999_v11  ;;  %v1797_v43 = vadd.f32 %v1765_v40, %v3950_v38  ;;  %v1942_v51 = vpack.c.bf16 %v1918_v52, %v1917_v45 }
 0x344   : > { %v1704_v47 = vmul.f32 0.044715, %v4009_v15  ;;  %v4016_v36 = vadd.f32 %v2491_v31, %v3802_v3  ;;  %v1828_v26 = vmul.f32 0.7978846, %v1796_v16  ;;  %2772 = vtanh.f32 %v1827_v56 }
 0x345   : > { %v1632_v6 = vpop.f32.mrf.mxu1  ;;  %v1941_v8 = vpack.c.bf16 %v1916_v39, %v1915_v1  ;;  %v1737_v46 = vmul.f32 %v1705_v24, %v3988_v53  ;;  %v1798_v13 = vadd.f32 %v1766_v19, %v3964_v33  ;;  %v1829_v18 = vmul.f32 0.7978846, %v1797_v43 }
 0x346   : > { %v2765_v21 = vpop.eup %2764  ;;  %v1736_v59 = vmul.f32 %v1704_v47, %v4009_v15  ;;  %v1709_v41 = vmul.f32 0.044715, %v4016_v36  ;;  %v4022_v28 = vadd.f32 %v3802_v3, %v1632_v6  ;;  %2774 = vtanh.f32 %v1828_v26 }
 0x347   : > { %v2492_v9 = vpop.f32.mrf.mxu1  ;;  %2521 = vmatprep.mubr.bf16.mxu0 %v1941_v8  ;;  %v1767_v32 = vmul.f32 %v1735_v62, %v3991_v30  ;;  %v1738_v27 = vmul.f32 %v1706_v12, %v3999_v11  ;;  %v1889_v25 = vadd.f32 1.0, %v2765_v21  ;;  %v1830_v4 = vmul.f32 0.7978846, %v1798_v13 }
 0x348   : > { %v2767_v63 = vpop.eup %2766  ;;  %v1707_v0 = vmul.f32 0.044715, %v4022_v28  ;;  %v4030_v14 = vadd.f32 %v2492_v9, %v3802_v3  ;;  %2522 = vmatmul.mubr.bf16.gmra.mxu0 %v1942_v51  ;;  %v1768_v2 = vmul.f32 %v1736_v59, %v4009_v15  ;;  %2776 = vtanh.f32 %v1829_v18 }
 0x349   : > { %v1635_v44 = vpop.f32.mrf.mxu1  ;;  %v1741_v61 = vmul.f32 %v1709_v41, %v4016_v36  ;;  %v1769_v34 = vmul.f32 %v1737_v46, %v3988_v53  ;;  %v1887_v29 = vadd.f32 1.0, %v2767_v63  ;;  %2778 = vtanh.f32 %v1830_v4 }
 0x34a   : > { %v2769_v55 = vpop.eup %2768  ;;  %v1739_v17 = vmul.f32 %v1707_v0, %v4022_v28  ;;  %v1710_v10 = vmul.f32 0.044715, %v4030_v14  ;;  %v4037_v5 = vadd.f32 %v3802_v3, %v1635_v44  ;;  %v1770_v50 = vmul.f32 %v1738_v27, %v3999_v11 }
 0x34b   : > { %v1890_v23 = vadd.f32 1.0, %v2769_v55  ;;  %v2771_v57 = vpop.eup %2770  ;;  %v1799_v3 = vadd.f32 %v1767_v32, %v3991_v30  ;;  %v1800_v45 = vadd.f32 %v1768_v2, %v4009_v15  ;;  %v1773_v7 = vmul.f32 %v1741_v61, %v4016_v36 }
 0x34c   : > { %v1771_v20 = vmul.f32 %v1739_v17, %v4022_v28  ;;  %v1742_v49 = vmul.f32 %v1710_v10, %v4030_v14  ;;  %v1708_v40 = vmul.f32 0.044715, %v4037_v5  ;;  %v1888_v35 = vadd.f32 1.0, %v2771_v57 }
 0x34d   : > { %v1922_v54 = vmul.f32 %v1890_v23, %v3994_v42  ;;  %v1921_v24 = vmul.f32 %v1889_v25, %v3982_v22  ;;  %v1919_v52 = vmul.f32 %v1887_v29, %v3979_v60  ;;  %v1831_v1 = vmul.f32 0.7978846, %v1799_v3 }
 0x34e   : > { %v1740_v19 = vmul.f32 %v1708_v40, %v4037_v5  ;;  %v1920_v31 = vmul.f32 %v1888_v35, %v4002_v48  ;;  %v1832_v39 = vmul.f32 0.7978846, %v1800_v45  ;;  %v1774_v16 = vmul.f32 %v1742_v49, %v4030_v14 }
 0x34f   : > { %v1801_v56 = vadd.f32 %v1769_v34, %v3988_v53  ;;  %v1802_v62 = vadd.f32 %v1770_v50, %v3999_v11  ;;  %v1944_v47 = vpack.c.bf16 %v1922_v54, %v1921_v24  ;;  %2780 = vtanh.f32 %v1831_v1 }
 0x350   : > { %v1772_v42 = vmul.f32 %v1740_v19, %v4037_v5  ;;  %v1943_v12 = vpack.c.bf16 %v1920_v31, %v1919_v52  ;;  %v1803_v6 = vadd.f32 %v1771_v20, %v4022_v28  ;;  %2782 = vtanh.f32 %v1832_v39 }
 0x351   : > { %v2773_v22 = vpop.eup %2772  ;;  %v1833_v60 = vmul.f32 0.7978846, %v1801_v56  ;;  %v1834_v8 = vmul.f32 0.7978846, %v1802_v62  ;;  %v1805_v41 = vadd.f32 %v1773_v7, %v4016_v36  ;;  %v1806_v51 = vadd.f32 %v1774_v16, %v4030_v14 }
 0x352   : > { %v1804_v48 = vadd.f32 %v1772_v42, %v4037_v5  ;;  %2525 = vmatprep.mubr.bf16.mxu0 %v1943_v12  ;;  %v1891_v26 = vadd.f32 1.0, %v2773_v22  ;;  %v1835_v43 = vmul.f32 0.7978846, %v1803_v6  ;;  %v1667_v46 = vmul.f32 0.5, %v3956_v58 }
 0x353   : > { %v2775_v21 = vpop.eup %2774  ;;  %2526 = vmatmul.mubr.bf16.gmra.mxu0 %v1944_v47  ;;  %2784 = vtanh.f32 %v1833_v60  ;;  %v1668_v9 = vmul.f32 0.5, %v3971_v37  ;;  %v1837_v63 = vmul.f32 0.7978846, %v1805_v41  ;;  %v1838_v32 = vmul.f32 0.7978846, %v1806_v51 }
 0x354   : > { %v1836_v59 = vmul.f32 0.7978846, %v1804_v48  ;;  %v1892_v13 = vadd.f32 1.0, %v2775_v21  ;;  %2786 = vtanh.f32 %v1834_v8  ;;  %v1923_v27 = vmul.f32 %v1891_v26, %v1667_v46  ;;  %v4078_v60 = vld [vmem:[%s4205_s8] ss:$0 sm:$0xff] }
 0x355   : > { %v2777_v18 = vpop.eup %2776  ;;  %2788 = vtanh.f32 %v1835_v43  ;;  %v1669_v25 = vmul.f32 0.5, %v3950_v38  ;;  %v1670_v55 = vmul.f32 0.5, %v3964_v33  ;;  %v1671_v23 = vmul.f32 0.5, %v3991_v30 }
 0x356   : > { %v1924_v0 = vmul.f32 %v1892_v13, %v1668_v9  ;;  %v1893_v2 = vadd.f32 1.0, %v2777_v18  ;;  %2790 = vtanh.f32 %v1836_v59  ;;  %v2779_v44 = vpop.eup %2778  ;;  %v1672_v57 = vmul.f32 0.5, %v4009_v15 }
 0x357   : > { %2792 = vtanh.f32 %v1837_v63  ;;  %v1894_v58 = vadd.f32 1.0, %v2779_v44  ;;  %v1673_v54 = vmul.f32 0.5, %v3988_v53  ;;  %v1674_v3 = vmul.f32 0.5, %v3999_v11 }
 0x358   : > { %v1945_v4 = vpack.c.bf16 %v1924_v0, %v1923_v27  ;;  %2794 = vtanh.f32 %v1838_v32  ;;  %v1925_v37 = vmul.f32 %v1893_v2, %v1669_v25  ;;  %v1675_v24 = vmul.f32 0.5, %v4022_v28 }
 0x359   : > { %v1926_v61 = vmul.f32 %v1894_v58, %v1670_v55  ;;  %v1676_v1 = vmul.f32 0.5, %v4037_v5  ;;  %v1678_v12 = vmul.f32 0.5, %v4030_v14  ;;  %v1677_v47 = vmul.f32 0.5, %v4016_v36 }
 0x35a   : > { %2529 = vmatprep.mubr.bf16.mxu0 %v1945_v4 }
 0x35b   : > { %v1946_v17 = vpack.c.bf16 %v1926_v61, %v1925_v37 }
 0x35c   : > { %v2781_v10 = vpop.eup %2780 }
 0x35d   : > { %v2783_v34 = vpop.eup %2782  ;;  %2530 = vmatmul.mubr.bf16.gmra.mxu0 %v1946_v17  ;;  %v1895_v29 = vadd.f32 1.0, %v2781_v10 }
 0x35e   : > { %v1896_v50 = vadd.f32 1.0, %v2783_v34 }
 0x35f   : > { %v1927_v49 = vmul.f32 %v1895_v29, %v1671_v23 }
 0x360   : > { %v2785_v38 = vpop.eup %2784  ;;  %v1928_v40 = vmul.f32 %v1896_v50, %v1672_v57 }
 0x361   : > { %v2787_v20 = vpop.eup %2786  ;;  %v1897_v33 = vadd.f32 1.0, %v2785_v38 }
 0x362   : > { %v2789_v35 = vpop.eup %2788  ;;  %v1898_v45 = vadd.f32 1.0, %v2787_v20  ;;  %v1947_v19 = vpack.c.bf16 %v1928_v40, %v1927_v49 }
 0x363   : > { %v2791_v7 = vpop.eup %2790  ;;  %v1899_v52 = vadd.f32 1.0, %v2789_v35  ;;  %v1929_v31 = vmul.f32 %v1897_v33, %v1673_v54 }
 0x364   : > { %v2793_v30 = vpop.eup %2792  ;;  %v1930_v15 = vmul.f32 %v1898_v45, %v1674_v3  ;;  %v1900_v39 = vadd.f32 1.0, %v2791_v7  ;;  %2533 = vmatprep.mubr.bf16.mxu0 %v1947_v19 }
 0x365   : > { %v2795_v16 = vpop.eup %2794  ;;  %v1931_v53 = vmul.f32 %v1899_v52, %v1675_v24  ;;  %v1901_v28 = vadd.f32 1.0, %v2793_v30 }
 0x366   : > { %v1948_v42 = vpack.c.bf16 %v1930_v15, %v1929_v31  ;;  %v1932_v56 = vmul.f32 %v1900_v39, %v1676_v1  ;;  %v1902_v11 = vadd.f32 1.0, %v2795_v16 }
 0x367   : > { %v1933_v22 = vmul.f32 %v1901_v28, %v1677_v47 }
 0x368   : > { %2534 = vmatmul.mubr.bf16.gmra.mxu0 %v1948_v42  ;;  %v1949_v62 = vpack.c.bf16 %v1932_v56, %v1931_v53  ;;  %v1934_v6 = vmul.f32 %v1902_v11, %v1678_v12 }
 0x36a   : > { %2537 = vmatprep.mubr.bf16.mxu0 %v1949_v62  ;;  %v1950_v5 = vpack.c.bf16 %v1934_v6, %v1933_v22 }
 0x370   : > { %2538 = vmatmul.mubr.bf16.gmra.mxu0 %v1950_v5 }
 0x3e8   : > { %v2511_v8 = vpop.f32.mrf.mxu0 }
 0x3e9   : > { %v2065_v48 = vadd.f32 %v2511_v8, %v4078_v60 }
 0x3ea   : > { %v2056_v14 = vpop.f32.mrf.mxu0 }
 0x3eb   : > { %2185 = vst [vmem:[%s4081_s26 + $0x10] sm:$0xff] %v2065_v48  ;;  %v2057_v36 = vadd.f32 %v4078_v60, %v2056_v14 }
 0x3ec   : > { %v2512_v26 = vpop.f32.mrf.mxu0 }
 0x3ed   : > { %2183 = vst [vmem:[%s4081_s26] sm:$0xff] %v2057_v36  ;;  %v2068_v43 = vadd.f32 %v2512_v26, %v4078_v60 }
 0x3ee   : > { %v2059_v21 = vpop.f32.mrf.mxu0 }
 0x3ef   : > { %2186 = vst [vmem:[%s4081_s26 + $0x18] sm:$0xff] %v2068_v43  ;;  %v2060_v59 = vadd.f32 %v4078_v60, %v2059_v21 }
 0x3f0   : > { %v2515_v41 = vpop.f32.mrf.mxu0 }
 0x3f1   : > { %2184 = vst [vmem:[%s4081_s26 + $0x8] sm:$0xff] %v2060_v59  ;;  %v2081_v51 = vadd.f32 %v2515_v41, %v4078_v60 }
 0x3f2   : > { %v2072_v46 = vpop.f32.mrf.mxu0 }
 0x3f3   : > { %2189 = vst [vmem:[%s4081_s26 + $0x30] sm:$0xff] %v2081_v51  ;;  %v2073_v9 = vadd.f32 %v4078_v60, %v2072_v46 }
 0x3f4   : > { %v2516_v13 = vpop.f32.mrf.mxu0 }
 0x3f5   : > { %2187 = vst [vmem:[%s4081_s26 + $0x20] sm:$0xff] %v2073_v9  ;;  %v2084_v18 = vadd.f32 %v2516_v13, %v4078_v60 }
 0x3f6   : > { %v2075_v63 = vpop.f32.mrf.mxu0 }
 0x3f7   : > { %2190 = vst [vmem:[%s4081_s26 + $0x38] sm:$0xff] %v2084_v18  ;;  %v2076_v32 = vadd.f32 %v4078_v60, %v2075_v63 }
 0x3f8   : > { %v2519_v27 = vpop.f32.mrf.mxu0 }
 0x3f9   : > { %2188 = vst [vmem:[%s4081_s26 + $0x28] sm:$0xff] %v2076_v32  ;;  %v2097_v0 = vadd.f32 %v2519_v27, %v4078_v60 }
 0x3fa   : > { %v2088_v2 = vpop.f32.mrf.mxu0 }
 0x3fb   : > { %2193 = vst [vmem:[%s4081_s26 + $0x50] sm:$0xff] %v2097_v0  ;;  %v2089_v44 = vadd.f32 %v4078_v60, %v2088_v2 }
 0x3fc   : > { %v2520_v25 = vpop.f32.mrf.mxu0 }
 0x3fd   : > { %2191 = vst [vmem:[%s4081_s26 + $0x40] sm:$0xff] %v2089_v44  ;;  %v2100_v4 = vadd.f32 %v2520_v25, %v4078_v60 }
 0x3fe   : > { %v2091_v55 = vpop.f32.mrf.mxu0 }
 0x3ff   : > { %2194 = vst [vmem:[%s4081_s26 + $0x58] sm:$0xff] %v2100_v4  ;;  %v2092_v58 = vadd.f32 %v4078_v60, %v2091_v55 }
 0x401   : > { %2192 = vst [vmem:[%s4081_s26 + $0x48] sm:$0xff] %v2092_v58 }
 0x408   : > { %v2523_v37 = vpop.f32.mrf.mxu0 }
 0x409   : > { %v2113_v61 = vadd.f32 %v2523_v37, %v4078_v60 }
 0x40a   : > { %v2104_v17 = vpop.f32.mrf.mxu0 }
 0x40b   : > { %2197 = vst [vmem:[%s4081_s26 + $0x70] sm:$0xff] %v2113_v61  ;;  %v2105_v10 = vadd.f32 %v4078_v60, %v2104_v17 }
 0x40c   : > { %v2524_v34 = vpop.f32.mrf.mxu0 }
 0x40d   : > { %2195 = vst [vmem:[%s4081_s26 + $0x60] sm:$0xff] %v2105_v10  ;;  %v2116_v29 = vadd.f32 %v2524_v34, %v4078_v60 }
 0x40e   : > { %v2107_v23 = vpop.f32.mrf.mxu0 }
 0x40f   : > { %2198 = vst [vmem:[%s4081_s26 + $0x78] sm:$0xff] %v2116_v29  ;;  %v2108_v57 = vadd.f32 %v4078_v60, %v2107_v23 }
 0x411   : > { %2196 = vst [vmem:[%s4081_s26 + $0x68] sm:$0xff] %v2108_v57 }
 0x413   : > { %v2527_v50 = vpop.f32.mrf.mxu0 }
 0x414   : > { %v2129_v38 = vadd.f32 %v2527_v50, %v4078_v60 }
 0x415   : > { %v2120_v20 = vpop.f32.mrf.mxu0 }
 0x416   : > { %2201 = vst [vmem:[%s4081_s26 + $0x90] sm:$0xff] %v2129_v38  ;;  %v2121_v49 = vadd.f32 %v4078_v60, %v2120_v20 }
 0x417   : > { %v2528_v40 = vpop.f32.mrf.mxu0 }
 0x418   : > { %2199 = vst [vmem:[%s4081_s26 + $0x80] sm:$0xff] %v2121_v49  ;;  %v2132_v33 = vadd.f32 %v2528_v40, %v4078_v60 }
 0x419   : > { %v2123_v35 = vpop.f32.mrf.mxu0 }
 0x41a   : > { %2202 = vst [vmem:[%s4081_s26 + $0x98] sm:$0xff] %v2132_v33  ;;  %v2124_v54 = vadd.f32 %v4078_v60, %v2123_v35 }
 0x41c   : > { %2200 = vst [vmem:[%s4081_s26 + $0x88] sm:$0xff] %v2124_v54 }
 0x41d   : > { %v2531_v3 = vpop.f32.mrf.mxu0 }
 0x41e   : > { %v2145_v45 = vadd.f32 %v2531_v3, %v4078_v60 }
 0x41f   : > { %v2136_v7 = vpop.f32.mrf.mxu0 }
 0x420   : > { %2205 = vst [vmem:[%s4081_s26 + $0xb0] sm:$0xff] %v2145_v45  ;;  %v2137_v19 = vadd.f32 %v4078_v60, %v2136_v7 }
 0x421   : > { %v2532_v24 = vpop.f32.mrf.mxu0 }
 0x422   : > { %2203 = vst [vmem:[%s4081_s26 + $0xa0] sm:$0xff] %v2137_v19  ;;  %v2148_v52 = vadd.f32 %v2532_v24, %v4078_v60 }
 0x423   : > { %v2139_v30 = vpop.f32.mrf.mxu0 }
 0x424   : > { %2206 = vst [vmem:[%s4081_s26 + $0xb8] sm:$0xff] %v2148_v52  ;;  %v2140_v31 = vadd.f32 %v4078_v60, %v2139_v30 }
 0x426   : > { %2204 = vst [vmem:[%s4081_s26 + $0xa8] sm:$0xff] %v2140_v31 }
 0x428   : > { %v2535_v15 = vpop.f32.mrf.mxu0 }
 0x429   : > { %v2161_v1 = vadd.f32 %v2535_v15, %v4078_v60 }
 0x42a   : > { %v2152_v39 = vpop.f32.mrf.mxu0 }
 0x42b   : > { %2209 = vst [vmem:[%s4081_s26 + $0xd0] sm:$0xff] %v2161_v1  ;;  %v2153_v16 = vadd.f32 %v4078_v60, %v2152_v39 }
 0x42c   : > { %v2536_v42 = vpop.f32.mrf.mxu0 }
 0x42d   : > { %2207 = vst [vmem:[%s4081_s26 + $0xc0] sm:$0xff] %v2153_v16  ;;  %v2164_v53 = vadd.f32 %v2536_v42, %v4078_v60 }
 0x42e   : > { %v2155_v56 = vpop.f32.mrf.mxu0 }
 0x42f   : > { %2210 = vst [vmem:[%s4081_s26 + $0xd8] sm:$0xff] %v2164_v53  ;;  %v2156_v11 = vadd.f32 %v4078_v60, %v2155_v56 }
 0x430   : > { %v2539_v62 = vpop.f32.mrf.mxu0 }
 0x431   : > { %2208 = vst [vmem:[%s4081_s26 + $0xc8] sm:$0xff] %v2156_v11  ;;  %v2177_v12 = vadd.f32 %v2539_v62, %v4078_v60 }
 0x432   : > { %v2168_v28 = vpop.f32.mrf.mxu0 }
 0x433   : > { %2213 = vst [vmem:[%s4081_s26 + $0xf0] sm:$0xff] %v2177_v12  ;;  %v2169_v47 = vadd.f32 %v4078_v60, %v2168_v28 }
 0x434   : > { %v2540_v6 = vpop.f32.mrf.mxu0 }
 0x435   : > { %2211 = vst [vmem:[%s4081_s26 + $0xe0] sm:$0xff] %v2169_v47  ;;  %v2180_v22 = vadd.f32 %v2540_v6, %v4078_v60 }
 0x436   : > { %v2171_v5 = vpop.f32.mrf.mxu0 }
 0x437   : > { %2214 = vst [vmem:[%s4081_s26 + $0xf8] sm:$0xff] %v2180_v22  ;;  %v2172_v8 = vadd.f32 %v4078_v60, %v2171_v5 }
 0x439   : > { %2212 = vst [vmem:[%s4081_s26 + $0xe8] sm:$0xff] %v2172_v8 }
 0x43a   : > { %2809 = shalt.err (!%p2806_p3)
}
 0x43b   : > { %s2810_s22 = scalar_lea.hbm %s4148_s16, 4096  ;;  %s2814_s27 = scalar_lea.hbm %s4206_s9, 8192 }
 0x43c   : > { %p2811_p4 = scmp.ne.s32.totalorder %s4148_s16, %s2810_s22  ;;  %p2815_p9 = scmp.lt.s32.totalorder %s4148_s16, %s4206_s9 }
 0x43d   : > { %p2816_p10 = scmp.lt.s32.totalorder %s2814_s27, %s2810_s22 }
 0x43e   : > { %p2812_p7 = pnand %p2811_p4, %p2949_p5 }
 0x43f   : > { %p2817_p11 = por %p2816_p10, %p2815_p9 }
 0x440   : > { %p2813_p8 = pneg %p2812_p7 }
 0x442   : > { %p2818_p12 = pnand %p2817_p11, %p2813_p8 }
 0x444   : > { %2821 = shalt.err (!%p2818_p12)
}
 0x445   : > { %s2859_s17 = smov 128   ;;  %s2860_s21 = smov 8  }
 0x446   : > { %2545 = dma.vmem_to_hbm [thread:$0]  (%p2949_p5), %s4150_s28, 4096, %s4148_s16, %s4157_s13, %s2859_s17, %s2859_s17, %s2860_s21  }
 0x447 PF: > { %p2551_p13 = scmp.ge.s32.totalorder %s2856_s12, 2  ;;  %s2244_s23 = sand.u32 1, %s2844_s30  }
 0x448   : > { %s2245_s24 = scalar_lea.sflag [#allocation3], %s2244_s23 }
 0x449   : > { %p2548_p0 = pnand %p2551_p13, %p2953_p6 }
 0x44b   : > { %p2549_p1 = pneg %p2548_p0 }
 0x44d   : > { %2839 = dma.done.wait (%p2549_p1), %s2245_s24, 4096  }
 0x44e   : > { %2841 = vsyncadd (%p2549_p1), %s2245_s24, 4294963200  ;;  %p19_p2 = scmp.ge.s32.totalorder %s2936_s15, 4   ;;  %s4209_s30 = smov %s2848_s10 }
 0x44f   : > { %s4210_s10 = smov %s2852_s11  ;;  %s4211_s11 = smov %s2947_s18 }
 0x450   : > { %s4212_s12 = smov %s2936_s15  ;;  %21 = sbr.rel (!%p19_p2) target bundleno = 3 (0x3), region = 91 }
 0x455   :  { %2250 = vsyncpa [#allocation3], 1 }
 0x456   :  { %2252 = vsyncpa [#allocation3 + $0x1], 1 }

</bundles_post_ra>
